<compile_context>
chip_gen: v7x
topology: tpu7x:2x2x1
jax: 0.10.0
libtpu: 0.0.40
codegen_flags: <defaults>
</compile_context>

<pallas_src>
import functools

import numpy as np

import jax
import jax.numpy as jnp
from jax import lax
from jax.experimental import pallas as pl
from jax.experimental.pallas import tpu as pltpu

EPS = 1e-5          # nn.LayerNorm default
_MASK = -1e30       # large-finite mask value (avoids -inf 0/0 edge cases)


# ----------------------------------------------------------------------------
# small helpers
# ----------------------------------------------------------------------------
def _layernorm(v, g, b):
    # v: (R, H) f32; g, b: (1, H) f32
    mu = jnp.mean(v, axis=-1, keepdims=True)
    var = jnp.mean((v - mu) ** 2, axis=-1, keepdims=True)
    return (v - mu) * lax.rsqrt(var + EPS) * g + b


def _gelu_exact(x):
    # nn.GELU() default (approximate='none'): 0.5*x*(1+erf(x/sqrt(2)))
    return 0.5 * x * (1.0 + lax.erf(x * 0.7071067811865476))


def _full_spec(shape):
    rank = len(shape)
    return pl.BlockSpec(shape, lambda *args, _r=rank: (0,) * _r)


@functools.lru_cache(maxsize=None)
def _vmem_info():
    """(vmem_limit_bytes, tile caps) derived from the chip's physical VMEM."""
    try:
        cap = int(pltpu.get_tpu_info().vmem_capacity_bytes)
    except Exception:
        cap = 64 * 1024 * 1024
    limit = max(32 * 1024 * 1024, (cap * 7) // 8)
    if cap <= 64 * 1024 * 1024:        # v7x-class TensorCore: 64 MiB
        caps = dict(row=256, ffn=512, vocab=1024)
    else:                              # v5e / v6e: 128 MiB
        caps = dict(row=512, ffn=1024, vocab=2048)
    return limit, caps


def _pick_tile(dim, cap, candidates=(2048, 1024, 512, 256, 128)):
    # largest VMEM-capped candidate that evenly divides dim, else the full dim
    # (a full-extent block is always a legal TPU block shape).
    for c in candidates:
        if c <= cap and dim % c == 0:
            return c
    return dim


# ----------------------------------------------------------------------------
# kernel 1: LayerNorm1 + per-head fused QKV projection (weights streamed per head)
# ----------------------------------------------------------------------------
def _qkv_kernel(x_ref, ln_ref, w_ref, b_ref, q_ref, k_ref, v_ref, xn_sc, *, head_dim):
    h = pl.program_id(2)

    @pl.when(h == 0)                                    # LN once per row tile
    def _ln():
        lnp = ln_ref[...]
        xn_sc[...] = _layernorm(x_ref[0], lnp[0:1], lnp[1:2]).astype(jnp.bfloat16)

    qkv = jnp.dot(xn_sc[...], w_ref[0],
                  preferred_element_type=jnp.float32) + b_ref[0]     # (TR, 3d)
    qkv = qkv.astype(jnp.bfloat16)
    d = head_dim
    q_ref[0, 0] = qkv[:, :d]            # 1/sqrt(d) score scale pre-folded into Q
    k_ref[0, 0] = qkv[:, d:2 * d]
    v_ref[0, 0] = qkv[:, 2 * d:]


def qkv_project(x, ln1, wqkv, bqkv, *, n_heads):
    B, S, H = x.shape
    d = H // n_heads
    limit, caps = _vmem_info()
    TR = _pick_tile(S, caps["row"])
    nr = S // TR
    row_in = pl.BlockSpec((1, TR, H), lambda b, r, h: (b, r, 0))
    head_out = pl.BlockSpec((1, 1, TR, d), lambda b, r, h: (b, h, r, 0))
    out_shape = jax.ShapeDtypeStruct((B, n_heads, S, d), jnp.bfloat16)
    return pl.pallas_call(
        functools.partial(_qkv_kernel, head_dim=d),
        grid=(B, nr, n_heads),
        in_specs=[
            row_in,                                               # x (resident across h)
            _full_spec(ln1.shape),                                # ln1 (2, H)
            pl.BlockSpec((1, H, 3 * d), lambda b, r, h: (h, 0, 0)),   # per-head weight
            pl.BlockSpec((1, 1, 3 * d), lambda b, r, h: (h, 0, 0)),   # per-head bias
        ],
        out_specs=(head_out, head_out, head_out),
        out_shape=(out_shape,) * 3,
        scratch_shapes=[pltpu.VMEM((TR, H), jnp.bfloat16)],
        compiler_params=pltpu.CompilerParams(
            dimension_semantics=("parallel", "parallel", "arbitrary"),
            vmem_limit_bytes=limit),
    )(x, ln1, wqkv, bqkv)


# ----------------------------------------------------------------------------
# kernel 2: causal flash attention, packed lower-triangular schedule, per head
# ----------------------------------------------------------------------------
def _flash_kernel(sched_ref, q_ref, k_ref, v_ref, o_ref, m_sc, l_sc, acc_sc, *, tq, tk):
    t = pl.program_id(1)
    qi = sched_ref[0, t]
    ki = sched_ref[1, t]

    @pl.when(ki == 0)                                   # first KV tile of this q tile
    def _init():
        m_sc[...] = jnp.full_like(m_sc, _MASK)
        l_sc[...] = jnp.zeros_like(l_sc)
        acc_sc[...] = jnp.zeros_like(acc_sc)

    q = q_ref[0]                                        # (TQ, d) bf16, scale pre-folded
    k = k_ref[0]                                        # (TK, d) bf16
    v = v_ref[0]                                        # (TK, d) bf16
    s = lax.dot_general(q, k, (((1,), (1,)), ((), ())),
                        preferred_element_type=jnp.float32)          # (TQ, TK)
    row = qi * tq + lax.broadcasted_iota(jnp.int32, (tq, tk), 0)
    col = ki * tk + lax.broadcasted_iota(jnp.int32, (tq, tk), 1)
    s = jnp.where(row >= col, s, _MASK)

    m_prev = m_sc[...]
    m_new = jnp.maximum(m_prev, jnp.max(s, axis=-1, keepdims=True))
    alpha = jnp.exp(m_prev - m_new)
    p = jnp.exp(s - m_new)
    l_sc[...] = alpha * l_sc[...] + jnp.sum(p, axis=-1, keepdims=True)
    acc_sc[...] = alpha * acc_sc[...] + jnp.dot(
        p.astype(jnp.bfloat16), v, preferred_element_type=jnp.float32)
    m_sc[...] = m_new

    @pl.when(ki == qi)              # diagonal tile = last live KV tile for this q tile
    def _finalize():
        o_ref[0] = (acc_sc[...] * pl.reciprocal(l_sc[...], approx=True)
                    ).astype(o_ref.dtype)


def flash_attention(q, k, v):
    B, nH, S, d = q.shape
    limit, caps = _vmem_info()
    TQ = _pick_tile(S, caps["row"])
    TK = TQ
    nq = S // TQ
    BH = B * nH
    q3 = q.reshape(BH, S, d)
    k3 = k.reshape(BH, S, d)
    v3 = v.reshape(BH, S, d)
    # Packed causal schedule: only lower-triangular (qi, ki) pairs, ki ascending
    # within each qi so the finalizing diagonal tile comes last.
    pairs = np.array([(qi, ki) for qi in range(nq) for ki in range(qi + 1)],
                     dtype=np.int32).T                             # (2, T)
    T = pairs.shape[1]
    sched = jnp.asarray(pairs)
    out = pl.pallas_call(
        functools.partial(_flash_kernel, tq=TQ, tk=TK),
        grid_spec=pltpu.PrefetchScalarGridSpec(
            num_scalar_prefetch=1,
            grid=(BH, T),
            in_specs=[
                pl.BlockSpec((1, TQ, d), lambda bh, t, sched: (bh, sched[0, t], 0)),
                pl.BlockSpec((1, TK, d), lambda bh, t, sched: (bh, sched[1, t], 0)),
                pl.BlockSpec((1, TK, d), lambda bh, t, sched: (bh, sched[1, t], 0)),
            ],
            out_specs=pl.BlockSpec((1, TQ, d),
                                   lambda bh, t, sched: (bh, sched[0, t], 0)),
            scratch_shapes=[
                pltpu.VMEM((TQ, 1), jnp.float32),    # m (running max)
                pltpu.VMEM((TQ, 1), jnp.float32),    # l (running denom)
                pltpu.VMEM((TQ, d), jnp.float32),    # acc (per-head)
            ]),
        out_shape=jax.ShapeDtypeStruct((BH, S, d), jnp.bfloat16),
        compiler_params=pltpu.CompilerParams(
            dimension_semantics=("parallel", "arbitrary"),
            vmem_limit_bytes=limit),
    )(sched, q3, k3, v3)
    return out.reshape(B, nH, S, d)


# ----------------------------------------------------------------------------
# kernel 3: head-merge + residual1 + LayerNorm2 + FFN (GELU) + residual2
# ----------------------------------------------------------------------------
def _ffn_kernel(x_ref, attn_ref, ln_ref, w1_ref, b1_ref, w2_ref, b2_ref, o_ref,
                acc_sc, xn_sc, *, n_heads):
    f = pl.program_id(2)
    nf = pl.num_programs(2)

    @pl.when(f == 0)
    def _init():
        # concatenate per-head attention outputs along the feature axis
        merged = jnp.concatenate([attn_ref[0, h] for h in range(n_heads)],
                                 axis=-1).astype(jnp.float32)        # (TR, H)
        y = x_ref[0] + merged                          # residual 1 (attention)
        lnp = ln_ref[...]
        xn_sc[...] = _layernorm(y, lnp[0:1], lnp[1:2]).astype(jnp.bfloat16)
        acc_sc[...] = y + b2_ref[...]                  # residual 2 + output bias

    h1 = jnp.dot(xn_sc[...], w1_ref[...],
                 preferred_element_type=jnp.float32) + b1_ref[...]   # (TR, TF)
    h1 = _gelu_exact(h1).astype(jnp.bfloat16)
    acc_sc[...] += jnp.dot(h1, w2_ref[...], preferred_element_type=jnp.float32)

    @pl.when(f == nf - 1)
    def _done():
        o_ref[0] = acc_sc[...].astype(o_ref.dtype)


def ffn_block(x, attn, ln2, w1, b1, w2, b2, *, n_heads):
    B, S, H = x.shape
    F = w1.shape[1]
    d = H // n_heads
    limit, caps = _vmem_info()
    TR = _pick_tile(S, caps["row"])
    TF = _pick_tile(F, caps["ffn"])
    nr, nf = S // TR, F // TF
    return pl.pallas_call(
        functools.partial(_ffn_kernel, n_heads=n_heads),
        grid=(B, nr, nf),
        in_specs=[
            pl.BlockSpec((1, TR, H), lambda b, r, f: (b, r, 0)),          # x residual
            pl.BlockSpec((1, n_heads, TR, d), lambda b, r, f: (b, 0, r, 0)),  # attn
            _full_spec(ln2.shape),
            pl.BlockSpec((H, TF), lambda b, r, f: (0, f)),
            pl.BlockSpec((1, TF), lambda b, r, f: (0, f)),
            pl.BlockSpec((TF, H), lambda b, r, f: (f, 0)),
            _full_spec(b2.shape),
        ],
        out_specs=pl.BlockSpec((1, TR, H), lambda b, r, f: (b, r, 0)),
        out_shape=jax.ShapeDtypeStruct((B, S, H), jnp.float32),
        scratch_shapes=[pltpu.VMEM((TR, H), jnp.float32),
                        pltpu.VMEM((TR, H), jnp.bfloat16)],
        compiler_params=pltpu.CompilerParams(
            dimension_semantics=("parallel", "parallel", "arbitrary"),
            vmem_limit_bytes=limit),
    )(x, attn, ln2, w1, b1, w2, b2)


# ----------------------------------------------------------------------------
# kernel 4: final LayerNorm + tied vocab projection (B folded into rows)
# ----------------------------------------------------------------------------
def _final_kernel(x_ref, ln_ref, w_ref, b_ref, o_ref, xn_sc):
    vi = pl.program_id(1)

    @pl.when(vi == 0)
    def _init():
        lnp = ln_ref[...]
        xn_sc[...] = _layernorm(x_ref[...], lnp[0:1], lnp[1:2]).astype(jnp.bfloat16)

    o_ref[...] = (jnp.dot(xn_sc[...], w_ref[...],
                          preferred_element_type=jnp.float32)
                  + b_ref[...]).astype(o_ref.dtype)


def final_projection(x, ln, w_out_t, b_out):
    B, S, H = x.shape
    V = w_out_t.shape[1]
    limit, caps = _vmem_info()
    R = B * S
    TR = _pick_tile(R, caps["row"])
    TV = _pick_tile(V, caps["vocab"])
    nr, nv = R // TR, V // TV
    x2 = x.reshape(R, H)
    out = pl.pallas_call(
        _final_kernel,
        grid=(nr, nv),
        in_specs=[
            pl.BlockSpec((TR, H), lambda r, v: (r, 0)),
            _full_spec(ln.shape),
            pl.BlockSpec((H, TV), lambda r, v: (0, v)),
            pl.BlockSpec((1, TV), lambda r, v: (0, v)),
        ],
        out_specs=pl.BlockSpec((TR, TV), lambda r, v: (r, v)),
        out_shape=jax.ShapeDtypeStruct((R, V), jnp.float32),
        scratch_shapes=[pltpu.VMEM((TR, H), jnp.bfloat16)],
        compiler_params=pltpu.CompilerParams(
            dimension_semantics=("parallel", "arbitrary"),
            vmem_limit_bytes=limit),
    )(x2, ln, w_out_t, b_out)
    return out.reshape(B, S, V)


# ----------------------------------------------------------------------------
# glue: embedding + positional encoding, full forward, params
# ----------------------------------------------------------------------------
def positional_encoding(x, hidden_dim):
    # exact port of the PyTorch module's (unconventional) formulation
    B, S, H = x.shape
    pos = jnp.arange(S, dtype=jnp.float32) / 10000.0
    power = 2.0 * jnp.arange(hidden_dim, dtype=jnp.float32) / hidden_dim
    p = pos[:, None] ** power[None, :]            # 0**0 == 1.0, as in torch
    col = jnp.arange(hidden_dim)
    pe = jnp.where((col % 2 == 0)[None, :], jnp.sin(p), jnp.cos(p))
    return x + pe[None, :, :]


def transformer_forward(tokens, params, *, n_heads, hidden_dim):
    x = params["emb"][tokens] * (float(hidden_dim) ** 0.5)          # (B, S, H) f32
    x = positional_encoding(x, hidden_dim)
    # dropout p = 0.0 -> identity (no-op)
    for lp in params["layers"]:
        q, k, v = qkv_project(x, lp["ln1"], lp["wqkv"], lp["bqkv"], n_heads=n_heads)
        attn = flash_attention(q, k, v)                              # (B, nH, S, d) bf16
        x = ffn_block(x, attn, lp["ln2"], lp["w1"], lp["b1"], lp["w2"], lp["b2"],
                      n_heads=n_heads)                               # (B, S, H) f32
    return final_projection(x, params["ln"], params["w_out_t"], params["b_out"])


def init_params(key, *, n_heads, n_layers, hidden_dim, vocab_size, ffn_dim):
    d = hidden_dim // n_heads
    scale = 1.0 / (float(d) ** 0.5)               # attention scale folded into Q
    keys = jax.random.split(key, 1 + n_layers)
    # tied embedding / output weight: (V, H)
    emb = jax.random.normal(keys[0], (vocab_size, hidden_dim), jnp.float32) * 0.02

    def ln_pack(h):
        return jnp.concatenate([jnp.ones((1, h), jnp.float32),
                                jnp.zeros((1, h), jnp.float32)], axis=0)  # (2, H)

    layers = []
    for li in range(n_layers):
        k = jax.random.split(keys[1 + li], 5)
        wq = jax.random.normal(k[0], (hidden_dim, hidden_dim), jnp.float32) * 0.02
        wk = jax.random.normal(k[1], (hidden_dim, hidden_dim), jnp.float32) * 0.02
        wv = jax.random.normal(k[2], (hidden_dim, hidden_dim), jnp.float32) * 0.02
        # per-head fused (H, 3d) weights; 1/sqrt(d) folded into the Q columns
        wqkv = jnp.stack([
            jnp.concatenate([wq[:, h * d:(h + 1) * d] * scale,
                             wk[:, h * d:(h + 1) * d],
                             wv[:, h * d:(h + 1) * d]], axis=1)
            for h in range(n_heads)], axis=0).astype(jnp.bfloat16)   # (nH, H, 3d)
        bqkv = jnp.zeros((n_heads, 1, 3 * d), jnp.float32)
        layers.append(dict(
            ln1=ln_pack(hidden_dim),
            ln2=ln_pack(hidden_dim),
            wqkv=wqkv,
            bqkv=bqkv,
            w1=(jax.random.normal(k[3], (hidden_dim, ffn_dim), jnp.float32)
                * 0.02).astype(jnp.bfloat16),
            b1=jnp.zeros((1, ffn_dim), jnp.float32),
            w2=(jax.random.normal(k[4], (ffn_dim, hidden_dim), jnp.float32)
                * 0.02).astype(jnp.bfloat16),
            b2=jnp.zeros((1, hidden_dim), jnp.float32),
        ))

    return dict(
        emb=emb,
        layers=layers,
        ln=ln_pack(hidden_dim),
        w_out_t=emb.T.astype(jnp.bfloat16),       # (H, V): tied weight, pre-transposed
        b_out=jnp.zeros((1, vocab_size), jnp.float32),
    )


if __name__ == "__main__":
    # small config consistent with the module
    B, S = 2, 8
    n_heads, n_layers, hidden_dim, vocab_size, ffn_dim = 4, 2, 32, 64, 64
    # dropout = 0.0 -> F.dropout is the identity

    key = jax.random.PRNGKey(0)
    pkey, tkey = jax.random.split(key)
    params = init_params(pkey, n_heads=n_heads, n_layers=n_layers,
                         hidden_dim=hidden_dim, vocab_size=vocab_size,
                         ffn_dim=ffn_dim)
    tokens = jax.random.randint(tkey, (B, S), 0, vocab_size, dtype=jnp.int32)

    _vmem_info()   # prime the hardware query outside of tracing
    fwd = jax.jit(functools.partial(transformer_forward,
                                    n_heads=n_heads, hidden_dim=hidden_dim))
    logits = fwd(tokens, params)
    jax.block_until_ready(logits)
    assert logits.shape == (B, S, vocab_size), logits.shape
    assert bool(jnp.all(jnp.isfinite(logits)))
    print("KERNEL_OK")
</pallas_src>

<mosaic_0001>
module attributes {stable_mosaic.version = 11 : i64} {
  func.func @_qkv_kernel(%arg0: i32, %arg1: i32, %arg2: i32, %arg3: memref<1x8x32xf32, #tpu.memory_space<vmem>>, %arg4: memref<2x32xf32, #tpu.memory_space<vmem>>, %arg5: memref<1x32x24xbf16, #tpu.memory_space<vmem>>, %arg6: memref<1x1x24xf32, #tpu.memory_space<vmem>>, %arg7: memref<1x1x8x8xbf16, #tpu.memory_space<vmem>>, %arg8: memref<1x1x8x8xbf16, #tpu.memory_space<vmem>>, %arg9: memref<1x1x8x8xbf16, #tpu.memory_space<vmem>>, %arg10: memref<8x32xbf16, #tpu.memory_space<vmem>>) attributes {dimension_semantics = [#tpu.dimension_semantics<parallel>, #tpu.dimension_semantics<parallel>, #tpu.dimension_semantics<arbitrary>], iteration_bounds = array<i64: 2, 1, 4>, scalar_prefetch = 0 : i64, scratch_operands = 1 : i64, tpu.core_type = #tpu.core_type<tc>, window_params = [{transform_indices = @transform_0, window_bounds = array<i64: 1, 8, 32>}, {pipeline_mode = #tpu.pipeline_mode<synchronous>, transform_indices = @transform_1, window_bounds = array<i64: 2, 32>}, {transform_indices = @transform_2, window_bounds = array<i64: 1, 32, 24>}, {transform_indices = @transform_3, window_bounds = array<i64: 1, 1, 24>}, {transform_indices = @transform_4, window_bounds = array<i64: 1, 1, 8, 8>}, {transform_indices = @transform_5, window_bounds = array<i64: 1, 1, 8, 8>}, {transform_indices = @transform_6, window_bounds = array<i64: 1, 1, 8, 8>}]} {
    %c0_i32 = arith.constant 0 : i32
    %0 = arith.cmpi eq, %arg2, %c0_i32 : i32
    %1 = arith.extui %0 : i1 to i32
    %c0_i32_0 = arith.constant 0 : i32
    %2 = arith.cmpi ne, %1, %c0_i32_0 : i32
    scf.if %2 {
      %c0_20 = arith.constant 0 : index
      %c0_21 = arith.constant 0 : index
      %24 = vector.load %arg4[%c0_20, %c0_21] : memref<2x32xf32, #tpu.memory_space<vmem>>, vector<2x32xf32>
      %c0_22 = arith.constant 0 : index
      %c0_23 = arith.constant 0 : index
      %c0_24 = arith.constant 0 : index
      %25 = vector.load %arg3[%c0_22, %c0_23, %c0_24] : memref<1x8x32xf32, #tpu.memory_space<vmem>>, vector<1x8x32xf32>
      %26 = vector.shape_cast %25 : vector<1x8x32xf32> to vector<8x32xf32>
      %27 = vector.extract_strided_slice %24 {offsets = [0, 0], sizes = [1, 32], strides = [1, 1]} : vector<2x32xf32> to vector<1x32xf32>
      %28 = vector.extract_strided_slice %24 {offsets = [1, 0], sizes = [1, 32], strides = [1, 1]} : vector<2x32xf32> to vector<1x32xf32>
      %cst_25 = arith.constant dense<0.000000e+00> : vector<8xf32>
      %29 = vector.multi_reduction <add>, %26, %cst_25 [1] : vector<8x32xf32> to vector<8xf32>
      %30 = vector.shape_cast %29 : vector<8xf32> to vector<8x1xf32>
      %cst_26 = arith.constant 3.200000e+01 : f32
      %31 = vector.broadcast %cst_26 : f32 to vector<8x1xf32>
      %32 = arith.divf %30, %31 : vector<8x1xf32>
      %33 = vector.broadcast %32 : vector<8x1xf32> to vector<8x32xf32>
      %34 = arith.subf %26, %33 : vector<8x32xf32>
      %35 = arith.mulf %34, %34 : vector<8x32xf32>
      %cst_27 = arith.constant dense<0.000000e+00> : vector<8xf32>
      %36 = vector.multi_reduction <add>, %35, %cst_27 [1] : vector<8x32xf32> to vector<8xf32>
      %37 = vector.shape_cast %36 : vector<8xf32> to vector<8x1xf32>
      %cst_28 = arith.constant 3.200000e+01 : f32
      %38 = vector.broadcast %cst_28 : f32 to vector<8x1xf32>
      %39 = arith.divf %37, %38 : vector<8x1xf32>
      %40 = vector.broadcast %32 : vector<8x1xf32> to vector<8x32xf32>
      %41 = arith.subf %26, %40 : vector<8x32xf32>
      %cst_29 = arith.constant 9.99999974E-6 : f32
      %42 = vector.broadcast %cst_29 : f32 to vector<8x1xf32>
      %43 = arith.addf %39, %42 : vector<8x1xf32>
      %44 = math.rsqrt %43 : vector<8x1xf32>
      %45 = vector.broadcast %44 : vector<8x1xf32> to vector<8x32xf32>
      %46 = arith.mulf %41, %45 : vector<8x32xf32>
      %47 = vector.broadcast %27 : vector<1x32xf32> to vector<8x32xf32>
      %48 = arith.mulf %46, %47 : vector<8x32xf32>
      %49 = vector.broadcast %28 : vector<1x32xf32> to vector<8x32xf32>
      %50 = arith.addf %48, %49 : vector<8x32xf32>
      %51 = arith.truncf %50 : vector<8x32xf32> to vector<8x32xbf16>
      %c0_30 = arith.constant 0 : index
      %c0_31 = arith.constant 0 : index
      %52 = vector.load %arg10[%c0_30, %c0_31] : memref<8x32xbf16, #tpu.memory_space<vmem>>, vector<8x32xbf16>
      tpu.vector_store %arg10[%c0_30, %c0_31], %51 {strides = array<i32>} : memref<8x32xbf16, #tpu.memory_space<vmem>>, vector<8x32xbf16>,
    } else {
    }
    %c0 = arith.constant 0 : index
    %c0_1 = arith.constant 0 : index
    %3 = vector.load %arg10[%c0, %c0_1] : memref<8x32xbf16, #tpu.memory_space<vmem>>, vector<8x32xbf16>
    %c0_2 = arith.constant 0 : index
    %c0_3 = arith.constant 0 : index
    %c0_4 = arith.constant 0 : index
    %4 = vector.load %arg5[%c0_2, %c0_3, %c0_4] : memref<1x32x24xbf16, #tpu.memory_space<vmem>>, vector<1x32x24xbf16>
    %5 = vector.shape_cast %4 : vector<1x32x24xbf16> to vector<32x24xbf16>
    %cst = arith.constant dense<0.000000e+00> : vector<8x24xf32>
    %6 = tpu.matmul %3, %5, %cst {dimension_numbers = #tpu.dot_dimension_numbers<[1], [0], [0], [1], [0, 0, 1, 1], [], []>} : vector<8x32xbf16>, vector<32x24xbf16>, vector<8x24xf32> -> vector<8x24xf32>
    %c0_5 = arith.constant 0 : index
    %c0_6 = arith.constant 0 : index
    %c0_7 = arith.constant 0 : index
    %7 = vector.load %arg6[%c0_5, %c0_6, %c0_7] : memref<1x1x24xf32, #tpu.memory_space<vmem>>, vector<1x1x24xf32>
    %8 = vector.shape_cast %7 : vector<1x1x24xf32> to vector<1x24xf32>
    %9 = vector.broadcast %8 : vector<1x24xf32> to vector<8x24xf32>
    %10 = arith.addf %6, %9 : vector<8x24xf32>
    %11 = arith.truncf %10 : vector<8x24xf32> to vector<8x24xbf16>
    %12 = vector.extract_strided_slice %11 {offsets = [0, 0], sizes = [8, 8], strides = [1, 1]} : vector<8x24xbf16> to vector<8x8xbf16>
    %c0_8 = arith.constant 0 : index
    %c0_9 = arith.constant 0 : index
    %c0_10 = arith.constant 0 : index
    %c0_11 = arith.constant 0 : index
    %13 = vector.load %arg7[%c0_8, %c0_9, %c0_10, %c0_11] : memref<1x1x8x8xbf16, #tpu.memory_space<vmem>>, vector<1x1x8x8xbf16>
    %14 = vector.shape_cast %13 : vector<1x1x8x8xbf16> to vector<8x8xbf16>
    %15 = vector.shape_cast %12 : vector<8x8xbf16> to vector<1x1x8x8xbf16>
    tpu.vector_store %arg7[%c0_8, %c0_9, %c0_10, %c0_11], %15 {strides = array<i32>} : memref<1x1x8x8xbf16, #tpu.memory_space<vmem>>, vector<1x1x8x8xbf16>,
    %16 = vector.extract_strided_slice %11 {offsets = [0, 8], sizes = [8, 8], strides = [1, 1]} : vector<8x24xbf16> to vector<8x8xbf16>
    %c0_12 = arith.constant 0 : index
    %c0_13 = arith.constant 0 : index
    %c0_14 = arith.constant 0 : index
    %c0_15 = arith.constant 0 : index
    %17 = vector.load %arg8[%c0_12, %c0_13, %c0_14, %c0_15] : memref<1x1x8x8xbf16, #tpu.memory_space<vmem>>, vector<1x1x8x8xbf16>
    %18 = vector.shape_cast %17 : vector<1x1x8x8xbf16> to vector<8x8xbf16>
    %19 = vector.shape_cast %16 : vector<8x8xbf16> to vector<1x1x8x8xbf16>
    tpu.vector_store %arg8[%c0_12, %c0_13, %c0_14, %c0_15], %19 {strides = array<i32>} : memref<1x1x8x8xbf16, #tpu.memory_space<vmem>>, vector<1x1x8x8xbf16>,
    %20 = vector.extract_strided_slice %11 {offsets = [0, 16], sizes = [8, 8], strides = [1, 1]} : vector<8x24xbf16> to vector<8x8xbf16>
    %c0_16 = arith.constant 0 : index
    %c0_17 = arith.constant 0 : index
    %c0_18 = arith.constant 0 : index
    %c0_19 = arith.constant 0 : index
    %21 = vector.load %arg9[%c0_16, %c0_17, %c0_18, %c0_19] : memref<1x1x8x8xbf16, #tpu.memory_space<vmem>>, vector<1x1x8x8xbf16>
    %22 = vector.shape_cast %21 : vector<1x1x8x8xbf16> to vector<8x8xbf16>
    %23 = vector.shape_cast %20 : vector<8x8xbf16> to vector<1x1x8x8xbf16>
    tpu.vector_store %arg9[%c0_16, %c0_17, %c0_18, %c0_19], %23 {strides = array<i32>} : memref<1x1x8x8xbf16, #tpu.memory_space<vmem>>, vector<1x1x8x8xbf16>,
    return
  }
  func.func @transform_0(%arg0: i32, %arg1: i32, %arg2: i32) -> (i32, i32, i32) {
    %c0_i32 = arith.constant 0 : i32
    %c0_i32_0 = arith.constant 0 : i32
    return %arg0, %arg1, %c0_i32 : i32, i32, i32
  }
  func.func @transform_1(%arg0: i32, %arg1: i32, %arg2: i32) -> (i32, i32) {
    %c0_i32 = arith.constant 0 : i32
    %c0_i32_0 = arith.constant 0 : i32
    %c0_i32_1 = arith.constant 0 : i32
    return %c0_i32, %c0_i32_0 : i32, i32
  }
  func.func @transform_2(%arg0: i32, %arg1: i32, %arg2: i32) -> (i32, i32, i32) {
    %c0_i32 = arith.constant 0 : i32
    %c0_i32_0 = arith.constant 0 : i32
    %c0_i32_1 = arith.constant 0 : i32
    return %arg2, %c0_i32, %c0_i32_0 : i32, i32, i32
  }
  func.func @transform_3(%arg0: i32, %arg1: i32, %arg2: i32) -> (i32, i32, i32) {
    %c0_i32 = arith.constant 0 : i32
    %c0_i32_0 = arith.constant 0 : i32
    %c0_i32_1 = arith.constant 0 : i32
    return %arg2, %c0_i32, %c0_i32_0 : i32, i32, i32
  }
  func.func @transform_4(%arg0: i32, %arg1: i32, %arg2: i32) -> (i32, i32, i32, i32) {
    %c0_i32 = arith.constant 0 : i32
    %c0_i32_0 = arith.constant 0 : i32
    return %arg0, %arg2, %arg1, %c0_i32 : i32, i32, i32, i32
  }
  func.func @transform_5(%arg0: i32, %arg1: i32, %arg2: i32) -> (i32, i32, i32, i32) {
    %c0_i32 = arith.constant 0 : i32
    %c0_i32_0 = arith.constant 0 : i32
    return %arg0, %arg2, %arg1, %c0_i32 : i32, i32, i32, i32
  }
  func.func @transform_6(%arg0: i32, %arg1: i32, %arg2: i32) -> (i32, i32, i32, i32) {
    %c0_i32 = arith.constant 0 : i32
    %c0_i32_0 = arith.constant 0 : i32
    return %arg0, %arg2, %arg1, %c0_i32 : i32, i32, i32, i32
  }
}

module attributes {stable_mosaic.version = 11 : i64} {
  func.func @_ffn_kernel(%arg0: i32, %arg1: i32, %arg2: i32, %arg3: memref<1x8x32xf32, #tpu.memory_space<vmem>>, %arg4: memref<1x4x8x8xbf16, #tpu.memory_space<vmem>>, %arg5: memref<2x32xf32, #tpu.memory_space<vmem>>, %arg6: memref<32x64xbf16, #tpu.memory_space<vmem>>, %arg7: memref<1x64xf32, #tpu.memory_space<vmem>>, %arg8: memref<64x32xbf16, #tpu.memory_space<vmem>>, %arg9: memref<1x32xf32, #tpu.memory_space<vmem>>, %arg10: memref<1x8x32xf32, #tpu.memory_space<vmem>>, %arg11: memref<8x32xf32, #tpu.memory_space<vmem>>, %arg12: memref<8x32xbf16, #tpu.memory_space<vmem>>) attributes {dimension_semantics = [#tpu.dimension_semantics<parallel>, #tpu.dimension_semantics<parallel>, #tpu.dimension_semantics<arbitrary>], iteration_bounds = array<i64: 2, 1, 1>, scalar_prefetch = 0 : i64, scratch_operands = 2 : i64, tpu.core_type = #tpu.core_type<tc>, window_params = [{transform_indices = @transform_0, window_bounds = array<i64: 1, 8, 32>}, {transform_indices = @transform_1, window_bounds = array<i64: 1, 4, 8, 8>}, {pipeline_mode = #tpu.pipeline_mode<synchronous>, transform_indices = @transform_2, window_bounds = array<i64: 2, 32>}, {transform_indices = @transform_3, window_bounds = array<i64: 32, 64>}, {transform_indices = @transform_4, window_bounds = array<i64: 1, 64>}, {transform_indices = @transform_5, window_bounds = array<i64: 64, 32>}, {pipeline_mode = #tpu.pipeline_mode<synchronous>, transform_indices = @transform_6, window_bounds = array<i64: 1, 32>}, {transform_indices = @transform_7, window_bounds = array<i64: 1, 8, 32>}]} {
    %c0_i32 = arith.constant 0 : i32
    %0 = arith.cmpi eq, %arg2, %c0_i32 : i32
    %1 = arith.extui %0 : i1 to i32
    %c0_i32_0 = arith.constant 0 : i32
    %2 = arith.cmpi ne, %1, %c0_i32_0 : i32
    scf.if %2 {
      %c0_18 = arith.constant 0 : index
      %c0_19 = arith.constant 0 : index
      %c0_20 = arith.constant 0 : index
      %c0_21 = arith.constant 0 : index
      %26 = vector.load %arg4[%c0_18, %c0_19, %c0_20, %c0_21] : memref<1x4x8x8xbf16, #tpu.memory_space<vmem>>, vector<1x1x8x8xbf16>
      %27 = vector.shape_cast %26 : vector<1x1x8x8xbf16> to vector<8x8xbf16>
      %c0_22 = arith.constant 0 : index
      %c1 = arith.constant 1 : index
      %c0_23 = arith.constant 0 : index
      %c0_24 = arith.constant 0 : index
      %28 = vector.load %arg4[%c0_22, %c1, %c0_23, %c0_24] : memref<1x4x8x8xbf16, #tpu.memory_space<vmem>>, vector<1x1x8x8xbf16>
      %29 = vector.shape_cast %28 : vector<1x1x8x8xbf16> to vector<8x8xbf16>
      %c0_25 = arith.constant 0 : index
      %c2 = arith.constant 2 : index
      %c0_26 = arith.constant 0 : index
      %c0_27 = arith.constant 0 : index
      %30 = vector.load %arg4[%c0_25, %c2, %c0_26, %c0_27] : memref<1x4x8x8xbf16, #tpu.memory_space<vmem>>, vector<1x1x8x8xbf16>
      %31 = vector.shape_cast %30 : vector<1x1x8x8xbf16> to vector<8x8xbf16>
      %c0_28 = arith.constant 0 : index
      %c3 = arith.constant 3 : index
      %c0_29 = arith.constant 0 : index
      %c0_30 = arith.constant 0 : index
      %32 = vector.load %arg4[%c0_28, %c3, %c0_29, %c0_30] : memref<1x4x8x8xbf16, #tpu.memory_space<vmem>>, vector<1x1x8x8xbf16>
      %33 = vector.shape_cast %32 : vector<1x1x8x8xbf16> to vector<8x8xbf16>
      %34 = tpu.concatenate %27, %29, %31, %33 in 1 : vector<8x8xbf16>, vector<8x8xbf16>, vector<8x8xbf16>, vector<8x8xbf16> -> vector<8x32xbf16>
      %35 = arith.extf %34 : vector<8x32xbf16> to vector<8x32xf32>
      %c0_31 = arith.constant 0 : index
      %c0_32 = arith.constant 0 : index
      %c0_33 = arith.constant 0 : index
      %36 = vector.load %arg3[%c0_31, %c0_32, %c0_33] : memref<1x8x32xf32, #tpu.memory_space<vmem>>, vector<1x8x32xf32>
      %37 = vector.shape_cast %36 : vector<1x8x32xf32> to vector<8x32xf32>
      %38 = arith.addf %37, %35 : vector<8x32xf32>
      %c0_34 = arith.constant 0 : index
      %c0_35 = arith.constant 0 : index
      %39 = vector.load %arg5[%c0_34, %c0_35] : memref<2x32xf32, #tpu.memory_space<vmem>>, vector<2x32xf32>
      %40 = vector.extract_strided_slice %39 {offsets = [0, 0], sizes = [1, 32], strides = [1, 1]} : vector<2x32xf32> to vector<1x32xf32>
      %41 = vector.extract_strided_slice %39 {offsets = [1, 0], sizes = [1, 32], strides = [1, 1]} : vector<2x32xf32> to vector<1x32xf32>
      %cst_36 = arith.constant dense<0.000000e+00> : vector<8xf32>
      %42 = vector.multi_reduction <add>, %38, %cst_36 [1] : vector<8x32xf32> to vector<8xf32>
      %43 = vector.shape_cast %42 : vector<8xf32> to vector<8x1xf32>
      %cst_37 = arith.constant 3.200000e+01 : f32
      %44 = vector.broadcast %cst_37 : f32 to vector<8x1xf32>
      %45 = arith.divf %43, %44 : vector<8x1xf32>
      %46 = vector.broadcast %45 : vector<8x1xf32> to vector<8x32xf32>
      %47 = arith.subf %38, %46 : vector<8x32xf32>
      %48 = arith.mulf %47, %47 : vector<8x32xf32>
      %cst_38 = arith.constant dense<0.000000e+00> : vector<8xf32>
      %49 = vector.multi_reduction <add>, %48, %cst_38 [1] : vector<8x32xf32> to vector<8xf32>
      %50 = vector.shape_cast %49 : vector<8xf32> to vector<8x1xf32>
      %cst_39 = arith.constant 3.200000e+01 : f32
      %51 = vector.broadcast %cst_39 : f32 to vector<8x1xf32>
      %52 = arith.divf %50, %51 : vector<8x1xf32>
      %53 = vector.broadcast %45 : vector<8x1xf32> to vector<8x32xf32>
      %54 = arith.subf %38, %53 : vector<8x32xf32>
      %cst_40 = arith.constant 9.99999974E-6 : f32
      %55 = vector.broadcast %cst_40 : f32 to vector<8x1xf32>
      %56 = arith.addf %52, %55 : vector<8x1xf32>
      %57 = math.rsqrt %56 : vector<8x1xf32>
      %58 = vector.broadcast %57 : vector<8x1xf32> to vector<8x32xf32>
      %59 = arith.mulf %54, %58 : vector<8x32xf32>
      %60 = vector.broadcast %40 : vector<1x32xf32> to vector<8x32xf32>
      %61 = arith.mulf %59, %60 : vector<8x32xf32>
      %62 = vector.broadcast %41 : vector<1x32xf32> to vector<8x32xf32>
      %63 = arith.addf %61, %62 : vector<8x32xf32>
      %64 = arith.truncf %63 : vector<8x32xf32> to vector<8x32xbf16>
      %c0_41 = arith.constant 0 : index
      %c0_42 = arith.constant 0 : index
      %65 = vector.load %arg12[%c0_41, %c0_42] : memref<8x32xbf16, #tpu.memory_space<vmem>>, vector<8x32xbf16>
      tpu.vector_store %arg12[%c0_41, %c0_42], %64 {strides = array<i32>} : memref<8x32xbf16, #tpu.memory_space<vmem>>, vector<8x32xbf16>,
      %c0_43 = arith.constant 0 : index
      %c0_44 = arith.constant 0 : index
      %66 = vector.load %arg9[%c0_43, %c0_44] : memref<1x32xf32, #tpu.memory_space<vmem>>, vector<1x32xf32>
      %67 = vector.broadcast %66 : vector<1x32xf32> to vector<8x32xf32>
      %68 = arith.addf %38, %67 : vector<8x32xf32>
      %c0_45 = arith.constant 0 : index
      %c0_46 = arith.constant 0 : index
      %69 = vector.load %arg11[%c0_45, %c0_46] : memref<8x32xf32, #tpu.memory_space<vmem>>, vector<8x32xf32>
      tpu.vector_store %arg11[%c0_45, %c0_46], %68 {strides = array<i32>} : memref<8x32xf32, #tpu.memory_space<vmem>>, vector<8x32xf32>,
    } else {
    }
    %c0 = arith.constant 0 : index
    %c0_1 = arith.constant 0 : index
    %3 = vector.load %arg12[%c0, %c0_1] : memref<8x32xbf16, #tpu.memory_space<vmem>>, vector<8x32xbf16>
    %c0_2 = arith.constant 0 : index
    %c0_3 = arith.constant 0 : index
    %4 = vector.load %arg6[%c0_2, %c0_3] : memref<32x64xbf16, #tpu.memory_space<vmem>>, vector<32x64xbf16>
    %cst = arith.constant dense<0.000000e+00> : vector<8x64xf32>
    %5 = tpu.matmul %3, %4, %cst {dimension_numbers = #tpu.dot_dimension_numbers<[1], [0], [0], [1], [0, 0, 1, 1], [], []>} : vector<8x32xbf16>, vector<32x64xbf16>, vector<8x64xf32> -> vector<8x64xf32>
    %c0_4 = arith.constant 0 : index
    %c0_5 = arith.constant 0 : index
    %6 = vector.load %arg7[%c0_4, %c0_5] : memref<1x64xf32, #tpu.memory_space<vmem>>, vector<1x64xf32>
    %7 = vector.broadcast %6 : vector<1x64xf32> to vector<8x64xf32>
    %8 = arith.addf %5, %7 : vector<8x64xf32>
    %cst_6 = arith.constant 5.000000e-01 : f32
    %9 = vector.broadcast %cst_6 : f32 to vector<8x64xf32>
    %10 = arith.mulf %9, %8 : vector<8x64xf32>
    %cst_7 = arith.constant 0.707106769 : f32
    %11 = vector.broadcast %cst_7 : f32 to vector<8x64xf32>
    %12 = arith.mulf %8, %11 : vector<8x64xf32>
    %13 = math.erf %12 : vector<8x64xf32>
    %cst_8 = arith.constant 1.000000e+00 : f32
    %14 = vector.broadcast %cst_8 : f32 to vector<8x64xf32>
    %15 = arith.addf %14, %13 : vector<8x64xf32>
    %16 = arith.mulf %10, %15 : vector<8x64xf32>
    %17 = arith.truncf %16 : vector<8x64xf32> to vector<8x64xbf16>
    %c0_9 = arith.constant 0 : index
    %c0_10 = arith.constant 0 : index
    %18 = vector.load %arg11[%c0_9, %c0_10] : memref<8x32xf32, #tpu.memory_space<vmem>>, vector<8x32xf32>
    %c0_11 = arith.constant 0 : index
    %c0_12 = arith.constant 0 : index
    %19 = vector.load %arg8[%c0_11, %c0_12] : memref<64x32xbf16, #tpu.memory_space<vmem>>, vector<64x32xbf16>
    %cst_13 = arith.constant dense<0.000000e+00> : vector<8x32xf32>
    %20 = tpu.matmul %17, %19, %cst_13 {dimension_numbers = #tpu.dot_dimension_numbers<[1], [0], [0], [1], [0, 0, 1, 1], [], []>} : vector<8x64xbf16>, vector<64x32xbf16>, vector<8x32xf32> -> vector<8x32xf32>
    %21 = arith.addf %18, %20 : vector<8x32xf32>
    %c0_14 = arith.constant 0 : index
    %c0_15 = arith.constant 0 : index
    %22 = vector.load %arg11[%c0_14, %c0_15] : memref<8x32xf32, #tpu.memory_space<vmem>>, vector<8x32xf32>
    tpu.vector_store %arg11[%c0_14, %c0_15], %21 {strides = array<i32>} : memref<8x32xf32, #tpu.memory_space<vmem>>, vector<8x32xf32>,
    %c0_i32_16 = arith.constant 0 : i32
    %23 = arith.cmpi eq, %arg2, %c0_i32_16 : i32
    %24 = arith.extui %23 : i1 to i32
    %c0_i32_17 = arith.constant 0 : i32
    %25 = arith.cmpi ne, %24, %c0_i32_17 : i32
    scf.if %25 {
      %c0_18 = arith.constant 0 : index
      %c0_19 = arith.constant 0 : index
      %26 = vector.load %arg11[%c0_18, %c0_19] : memref<8x32xf32, #tpu.memory_space<vmem>>, vector<8x32xf32>
      %c0_20 = arith.constant 0 : index
      %c0_21 = arith.constant 0 : index
      %c0_22 = arith.constant 0 : index
      %27 = vector.load %arg10[%c0_20, %c0_21, %c0_22] : memref<1x8x32xf32, #tpu.memory_space<vmem>>, vector<1x8x32xf32>
      %28 = vector.shape_cast %27 : vector<1x8x32xf32> to vector<8x32xf32>
      %29 = vector.shape_cast %26 : vector<8x32xf32> to vector<1x8x32xf32>
      tpu.vector_store %arg10[%c0_20, %c0_21, %c0_22], %29 {strides = array<i32>} : memref<1x8x32xf32, #tpu.memory_space<vmem>>, vector<1x8x32xf32>,
    } else {
    }
    return
  }
  func.func @transform_0(%arg0: i32, %arg1: i32, %arg2: i32) -> (i32, i32, i32) {
    %c0_i32 = arith.constant 0 : i32
    %c0_i32_0 = arith.constant 0 : i32
    return %arg0, %arg1, %c0_i32 : i32, i32, i32
  }
  func.func @transform_1(%arg0: i32, %arg1: i32, %arg2: i32) -> (i32, i32, i32, i32) {
    %c0_i32 = arith.constant 0 : i32
    %c0_i32_0 = arith.constant 0 : i32
    %c0_i32_1 = arith.constant 0 : i32
    return %arg0, %c0_i32, %arg1, %c0_i32_0 : i32, i32, i32, i32
  }
  func.func @transform_2(%arg0: i32, %arg1: i32, %arg2: i32) -> (i32, i32) {
    %c0_i32 = arith.constant 0 : i32
    %c0_i32_0 = arith.constant 0 : i32
    %c0_i32_1 = arith.constant 0 : i32
    return %c0_i32, %c0_i32_0 : i32, i32
  }
  func.func @transform_3(%arg0: i32, %arg1: i32, %arg2: i32) -> (i32, i32) {
    %c0_i32 = arith.constant 0 : i32
    %c0_i32_0 = arith.constant 0 : i32
    return %c0_i32, %arg2 : i32, i32
  }
  func.func @transform_4(%arg0: i32, %arg1: i32, %arg2: i32) -> (i32, i32) {
    %c0_i32 = arith.constant 0 : i32
    %c0_i32_0 = arith.constant 0 : i32
    return %c0_i32, %arg2 : i32, i32
  }
  func.func @transform_5(%arg0: i32, %arg1: i32, %arg2: i32) -> (i32, i32) {
    %c0_i32 = arith.constant 0 : i32
    %c0_i32_0 = arith.constant 0 : i32
    return %arg2, %c0_i32 : i32, i32
  }
  func.func @transform_6(%arg0: i32, %arg1: i32, %arg2: i32) -> (i32, i32) {
    %c0_i32 = arith.constant 0 : i32
    %c0_i32_0 = arith.constant 0 : i32
    %c0_i32_1 = arith.constant 0 : i32
    return %c0_i32, %c0_i32_0 : i32, i32
  }
  func.func @transform_7(%arg0: i32, %arg1: i32, %arg2: i32) -> (i32, i32, i32) {
    %c0_i32 = arith.constant 0 : i32
    %c0_i32_0 = arith.constant 0 : i32
    return %arg0, %arg1, %c0_i32 : i32, i32, i32
  }
}

module attributes {stable_mosaic.version = 11 : i64} {
  func.func @_flash_kernel(%arg0: i32, %arg1: i32, %arg2: memref<2x1xi32, #tpu.memory_space<smem>>, %arg3: memref<1x8x8xbf16, #tpu.memory_space<vmem>>, %arg4: memref<1x8x8xbf16, #tpu.memory_space<vmem>>, %arg5: memref<1x8x8xbf16, #tpu.memory_space<vmem>>, %arg6: memref<1x8x8xbf16, #tpu.memory_space<vmem>>, %arg7: memref<8x1xf32, #tpu.memory_space<vmem>>, %arg8: memref<8x1xf32, #tpu.memory_space<vmem>>, %arg9: memref<8x8xf32, #tpu.memory_space<vmem>>) attributes {dimension_semantics = [#tpu.dimension_semantics<parallel>, #tpu.dimension_semantics<arbitrary>], iteration_bounds = array<i64: 8, 1>, scalar_prefetch = 1 : i64, scratch_operands = 3 : i64, tpu.core_type = #tpu.core_type<tc>, window_params = [{transform_indices = @transform_0, window_bounds = array<i64: 1, 8, 8>}, {transform_indices = @transform_1, window_bounds = array<i64: 1, 8, 8>}, {transform_indices = @transform_2, window_bounds = array<i64: 1, 8, 8>}, {transform_indices = @transform_3, window_bounds = array<i64: 1, 8, 8>}]} {
    %c0 = arith.constant 0 : index
    %0 = arith.index_cast %arg1 : i32 to index
    %1 = memref.load %arg2[%c0, %0] : memref<2x1xi32, #tpu.memory_space<smem>>
    %c1 = arith.constant 1 : index
    %2 = arith.index_cast %arg1 : i32 to index
    %3 = memref.load %arg2[%c1, %2] : memref<2x1xi32, #tpu.memory_space<smem>>
    %c0_i32 = arith.constant 0 : i32
    %4 = arith.cmpi eq, %3, %c0_i32 : i32
    %5 = arith.extui %4 : i1 to i32
    %c0_i32_0 = arith.constant 0 : i32
    %6 = arith.cmpi ne, %5, %c0_i32_0 : i32
    scf.if %6 {
      %cst_28 = arith.constant -1.000000e+30 : f32
      %51 = vector.broadcast %cst_28 : f32 to vector<8x1xf32>
      %c0_29 = arith.constant 0 : index
      %c0_30 = arith.constant 0 : index
      %52 = vector.load %arg7[%c0_29, %c0_30] : memref<8x1xf32, #tpu.memory_space<vmem>>, vector<8x1xf32>
      tpu.vector_store %arg7[%c0_29, %c0_30], %51 {strides = array<i32>} : memref<8x1xf32, #tpu.memory_space<vmem>>, vector<8x1xf32>,
      %cst_31 = arith.constant 0.000000e+00 : f32
      %53 = vector.broadcast %cst_31 : f32 to vector<8x1xf32>
      %c0_32 = arith.constant 0 : index
      %c0_33 = arith.constant 0 : index
      %54 = vector.load %arg8[%c0_32, %c0_33] : memref<8x1xf32, #tpu.memory_space<vmem>>, vector<8x1xf32>
      tpu.vector_store %arg8[%c0_32, %c0_33], %53 {strides = array<i32>} : memref<8x1xf32, #tpu.memory_space<vmem>>, vector<8x1xf32>,
      %cst_34 = arith.constant 0.000000e+00 : f32
      %55 = vector.broadcast %cst_34 : f32 to vector<8x8xf32>
      %c0_35 = arith.constant 0 : index
      %c0_36 = arith.constant 0 : index
      %56 = vector.load %arg9[%c0_35, %c0_36] : memref<8x8xf32, #tpu.memory_space<vmem>>, vector<8x8xf32>
      tpu.vector_store %arg9[%c0_35, %c0_36], %55 {strides = array<i32>} : memref<8x8xf32, #tpu.memory_space<vmem>>, vector<8x8xf32>,
    } else {
    }
    %c0_1 = arith.constant 0 : index
    %c0_2 = arith.constant 0 : index
    %c0_3 = arith.constant 0 : index
    %7 = vector.load %arg3[%c0_1, %c0_2, %c0_3] : memref<1x8x8xbf16, #tpu.memory_space<vmem>>, vector<1x8x8xbf16>
    %8 = vector.shape_cast %7 : vector<1x8x8xbf16> to vector<8x8xbf16>
    %c0_4 = arith.constant 0 : index
    %c0_5 = arith.constant 0 : index
    %c0_6 = arith.constant 0 : index
    %9 = vector.load %arg4[%c0_4, %c0_5, %c0_6] : memref<1x8x8xbf16, #tpu.memory_space<vmem>>, vector<1x8x8xbf16>
    %10 = vector.shape_cast %9 : vector<1x8x8xbf16> to vector<8x8xbf16>
    %c0_7 = arith.constant 0 : index
    %c0_8 = arith.constant 0 : index
    %c0_9 = arith.constant 0 : index
    %11 = vector.load %arg5[%c0_7, %c0_8, %c0_9] : memref<1x8x8xbf16, #tpu.memory_space<vmem>>, vector<1x8x8xbf16>
    %12 = vector.shape_cast %11 : vector<1x8x8xbf16> to vector<8x8xbf16>
    %cst = arith.constant dense<0.000000e+00> : vector<8x8xf32>
    %13 = tpu.matmul %8, %10, %cst {dimension_numbers = #tpu.dot_dimension_numbers<[1], [1], [0], [0], [0, 0, 1, 0], [], []>} : vector<8x8xbf16>, vector<8x8xbf16>, vector<8x8xf32> -> vector<8x8xf32>
    %c8_i32 = arith.constant 8 : i32
    %14 = arith.muli %1, %c8_i32 : i32
    %15 = tpu.iota {dimensions = array<i32: 0>} : vector<8x8xi32>
    %16 = vector.broadcast %14 : i32 to vector<8x8xi32>
    %17 = arith.addi %16, %15 : vector<8x8xi32>
    %c8_i32_10 = arith.constant 8 : i32
    %18 = arith.muli %3, %c8_i32_10 : i32
    %19 = tpu.iota {dimensions = array<i32: 1>} : vector<8x8xi32>
    %20 = vector.broadcast %18 : i32 to vector<8x8xi32>
    %21 = arith.addi %20, %19 : vector<8x8xi32>
    %22 = arith.cmpi sge, %17, %21 : vector<8x8xi32>
    %cst_11 = arith.constant -1.000000e+30 : f32
    %23 = vector.broadcast %cst_11 : f32 to vector<8x8xf32>
    %24 = arith.select %22, %13, %23 : vector<8x8xi1>, vector<8x8xf32>
    %c0_12 = arith.constant 0 : index
    %c0_13 = arith.constant 0 : index
    %25 = vector.load %arg7[%c0_12, %c0_13] : memref<8x1xf32, #tpu.memory_space<vmem>>, vector<8x1xf32>
    %cst_14 = arith.constant dense<0xFF800000> : vector<8xf32>
    %26 = vector.multi_reduction <maximumf>, %24, %cst_14 [1] : vector<8x8xf32> to vector<8xf32>
    %27 = vector.shape_cast %26 : vector<8xf32> to vector<8x1xf32>
    %28 = arith.maximumf %25, %27 : vector<8x1xf32>
    %29 = arith.subf %25, %28 : vector<8x1xf32>
    %30 = math.exp %29 : vector<8x1xf32>
    %31 = vector.broadcast %28 : vector<8x1xf32> to vector<8x8xf32>
    %32 = arith.subf %24, %31 : vector<8x8xf32>
    %33 = math.exp %32 : vector<8x8xf32>
    %c0_15 = arith.constant 0 : index
    %c0_16 = arith.constant 0 : index
    %34 = vector.load %arg8[%c0_15, %c0_16] : memref<8x1xf32, #tpu.memory_space<vmem>>, vector<8x1xf32>
    %35 = arith.mulf %30, %34 : vector<8x1xf32>
    %cst_17 = arith.constant dense<0.000000e+00> : vector<8xf32>
    %36 = vector.multi_reduction <add>, %33, %cst_17 [1] : vector<8x8xf32> to vector<8xf32>
    %37 = vector.shape_cast %36 : vector<8xf32> to vector<8x1xf32>
    %38 = arith.addf %35, %37 : vector<8x1xf32>
    %c0_18 = arith.constant 0 : index
    %c0_19 = arith.constant 0 : index
    %39 = vector.load %arg8[%c0_18, %c0_19] : memref<8x1xf32, #tpu.memory_space<vmem>>, vector<8x1xf32>
    tpu.vector_store %arg8[%c0_18, %c0_19], %38 {strides = array<i32>} : memref<8x1xf32, #tpu.memory_space<vmem>>, vector<8x1xf32>,
    %c0_20 = arith.constant 0 : index
    %c0_21 = arith.constant 0 : index
    %40 = vector.load %arg9[%c0_20, %c0_21] : memref<8x8xf32, #tpu.memory_space<vmem>>, vector<8x8xf32>
    %41 = vector.broadcast %30 : vector<8x1xf32> to vector<8x8xf32>
    %42 = arith.mulf %41, %40 : vector<8x8xf32>
    %43 = arith.truncf %33 : vector<8x8xf32> to vector<8x8xbf16>
    %cst_22 = arith.constant dense<0.000000e+00> : vector<8x8xf32>
    %44 = tpu.matmul %43, %12, %cst_22 {dimension_numbers = #tpu.dot_dimension_numbers<[1], [0], [0], [1], [0, 0, 1, 1], [], []>} : vector<8x8xbf16>, vector<8x8xbf16>, vector<8x8xf32> -> vector<8x8xf32>
    %45 = arith.addf %42, %44 : vector<8x8xf32>
    %c0_23 = arith.constant 0 : index
    %c0_24 = arith.constant 0 : index
    %46 = vector.load %arg9[%c0_23, %c0_24] : memref<8x8xf32, #tpu.memory_space<vmem>>, vector<8x8xf32>
    tpu.vector_store %arg9[%c0_23, %c0_24], %45 {strides = array<i32>} : memref<8x8xf32, #tpu.memory_space<vmem>>, vector<8x8xf32>,
    %c0_25 = arith.constant 0 : index
    %c0_26 = arith.constant 0 : index
    %47 = vector.load %arg7[%c0_25, %c0_26] : memref<8x1xf32, #tpu.memory_space<vmem>>, vector<8x1xf32>
    tpu.vector_store %arg7[%c0_25, %c0_26], %28 {strides = array<i32>} : memref<8x1xf32, #tpu.memory_space<vmem>>, vector<8x1xf32>,
    %48 = arith.cmpi eq, %3, %1 : i32
    %49 = arith.extui %48 : i1 to i32
    %c0_i32_27 = arith.constant 0 : i32
    %50 = arith.cmpi ne, %49, %c0_i32_27 : i32
    scf.if %50 {
      %c0_28 = arith.constant 0 : index
      %c0_29 = arith.constant 0 : index
      %51 = vector.load %arg9[%c0_28, %c0_29] : memref<8x8xf32, #tpu.memory_space<vmem>>, vector<8x8xf32>
      %c0_30 = arith.constant 0 : index
      %c0_31 = arith.constant 0 : index
      %52 = vector.load %arg8[%c0_30, %c0_31] : memref<8x1xf32, #tpu.memory_space<vmem>>, vector<8x1xf32>
      %53 = tpu.reciprocal %52 {approx = true} : vector<8x1xf32> -> vector<8x1xf32>
      %54 = vector.broadcast %53 : vector<8x1xf32> to vector<8x8xf32>
      %55 = arith.mulf %51, %54 : vector<8x8xf32>
      %56 = arith.truncf %55 : vector<8x8xf32> to vector<8x8xbf16>
      %c0_32 = arith.constant 0 : index
      %c0_33 = arith.constant 0 : index
      %c0_34 = arith.constant 0 : index
      %57 = vector.load %arg6[%c0_32, %c0_33, %c0_34] : memref<1x8x8xbf16, #tpu.memory_space<vmem>>, vector<1x8x8xbf16>
      %58 = vector.shape_cast %57 : vector<1x8x8xbf16> to vector<8x8xbf16>
      %59 = vector.shape_cast %56 : vector<8x8xbf16> to vector<1x8x8xbf16>
      tpu.vector_store %arg6[%c0_32, %c0_33, %c0_34], %59 {strides = array<i32>} : memref<1x8x8xbf16, #tpu.memory_space<vmem>>, vector<1x8x8xbf16>,
    } else {
    }
    return
  }
  func.func @transform_0(%arg0: i32, %arg1: i32, %arg2: memref<2x1xi32, #tpu.memory_space<smem>>) -> (i32, i32, i32) {
    %c0 = arith.constant 0 : index
    %0 = arith.index_cast %arg1 : i32 to index
    %1 = memref.load %arg2[%c0, %0] : memref<2x1xi32, #tpu.memory_space<smem>>
    %c0_i32 = arith.constant 0 : i32
    %c0_i32_0 = arith.constant 0 : i32
    return %arg0, %1, %c0_i32 : i32, i32, i32
  }
  func.func @transform_1(%arg0: i32, %arg1: i32, %arg2: memref<2x1xi32, #tpu.memory_space<smem>>) -> (i32, i32, i32) {
    %c1 = arith.constant 1 : index
    %0 = arith.index_cast %arg1 : i32 to index
    %1 = memref.load %arg2[%c1, %0] : memref<2x1xi32, #tpu.memory_space<smem>>
    %c0_i32 = arith.constant 0 : i32
    %c0_i32_0 = arith.constant 0 : i32
    return %arg0, %1, %c0_i32 : i32, i32, i32
  }
  func.func @transform_2(%arg0: i32, %arg1: i32, %arg2: memref<2x1xi32, #tpu.memory_space<smem>>) -> (i32, i32, i32) {
    %c1 = arith.constant 1 : index
    %0 = arith.index_cast %arg1 : i32 to index
    %1 = memref.load %arg2[%c1, %0] : memref<2x1xi32, #tpu.memory_space<smem>>
    %c0_i32 = arith.constant 0 : i32
    %c0_i32_0 = arith.constant 0 : i32
    return %arg0, %1, %c0_i32 : i32, i32, i32
  }
  func.func @transform_3(%arg0: i32, %arg1: i32, %arg2: memref<2x1xi32, #tpu.memory_space<smem>>) -> (i32, i32, i32) {
    %c0 = arith.constant 0 : index
    %0 = arith.index_cast %arg1 : i32 to index
    %1 = memref.load %arg2[%c0, %0] : memref<2x1xi32, #tpu.memory_space<smem>>
    %c0_i32 = arith.constant 0 : i32
    %c0_i32_0 = arith.constant 0 : i32
    return %arg0, %1, %c0_i32 : i32, i32, i32
  }
}

module attributes {stable_mosaic.version = 11 : i64} {
  func.func @_final_kernel(%arg0: i32, %arg1: i32, %arg2: memref<16x32xf32, #tpu.memory_space<vmem>>, %arg3: memref<2x32xf32, #tpu.memory_space<vmem>>, %arg4: memref<32x64xbf16, #tpu.memory_space<vmem>>, %arg5: memref<1x64xf32, #tpu.memory_space<vmem>>, %arg6: memref<16x64xf32, #tpu.memory_space<vmem>>, %arg7: memref<16x32xbf16, #tpu.memory_space<vmem>>) attributes {dimension_semantics = [#tpu.dimension_semantics<parallel>, #tpu.dimension_semantics<arbitrary>], iteration_bounds = array<i64: 1, 1>, scalar_prefetch = 0 : i64, scratch_operands = 1 : i64, tpu.core_type = #tpu.core_type<tc>, window_params = [{transform_indices = @transform_0, window_bounds = array<i64: 16, 32>}, {pipeline_mode = #tpu.pipeline_mode<synchronous>, transform_indices = @transform_1, window_bounds = array<i64: 2, 32>}, {transform_indices = @transform_2, window_bounds = array<i64: 32, 64>}, {transform_indices = @transform_3, window_bounds = array<i64: 1, 64>}, {transform_indices = @transform_4, window_bounds = array<i64: 16, 64>}]} {
    %c0_i32 = arith.constant 0 : i32
    %0 = arith.cmpi eq, %arg1, %c0_i32 : i32
    %1 = arith.extui %0 : i1 to i32
    %c0_i32_0 = arith.constant 0 : i32
    %2 = arith.cmpi ne, %1, %c0_i32_0 : i32
    scf.if %2 {
      %c0_8 = arith.constant 0 : index
      %c0_9 = arith.constant 0 : index
      %10 = vector.load %arg3[%c0_8, %c0_9] : memref<2x32xf32, #tpu.memory_space<vmem>>, vector<2x32xf32>
      %c0_10 = arith.constant 0 : index
      %c0_11 = arith.constant 0 : index
      %11 = vector.load %arg2[%c0_10, %c0_11] : memref<16x32xf32, #tpu.memory_space<vmem>>, vector<16x32xf32>
      %12 = vector.extract_strided_slice %10 {offsets = [0, 0], sizes = [1, 32], strides = [1, 1]} : vector<2x32xf32> to vector<1x32xf32>
      %13 = vector.extract_strided_slice %10 {offsets = [1, 0], sizes = [1, 32], strides = [1, 1]} : vector<2x32xf32> to vector<1x32xf32>
      %cst_12 = arith.constant dense<0.000000e+00> : vector<16xf32>
      %14 = vector.multi_reduction <add>, %11, %cst_12 [1] : vector<16x32xf32> to vector<16xf32>
      %15 = vector.shape_cast %14 : vector<16xf32> to vector<16x1xf32>
      %cst_13 = arith.constant 3.200000e+01 : f32
      %16 = vector.broadcast %cst_13 : f32 to vector<16x1xf32>
      %17 = arith.divf %15, %16 : vector<16x1xf32>
      %18 = vector.broadcast %17 : vector<16x1xf32> to vector<16x32xf32>
      %19 = arith.subf %11, %18 : vector<16x32xf32>
      %20 = arith.mulf %19, %19 : vector<16x32xf32>
      %cst_14 = arith.constant dense<0.000000e+00> : vector<16xf32>
      %21 = vector.multi_reduction <add>, %20, %cst_14 [1] : vector<16x32xf32> to vector<16xf32>
      %22 = vector.shape_cast %21 : vector<16xf32> to vector<16x1xf32>
      %cst_15 = arith.constant 3.200000e+01 : f32
      %23 = vector.broadcast %cst_15 : f32 to vector<16x1xf32>
      %24 = arith.divf %22, %23 : vector<16x1xf32>
      %25 = vector.broadcast %17 : vector<16x1xf32> to vector<16x32xf32>
      %26 = arith.subf %11, %25 : vector<16x32xf32>
      %cst_16 = arith.constant 9.99999974E-6 : f32
      %27 = vector.broadcast %cst_16 : f32 to vector<16x1xf32>
      %28 = arith.addf %24, %27 : vector<16x1xf32>
      %29 = math.rsqrt %28 : vector<16x1xf32>
      %30 = vector.broadcast %29 : vector<16x1xf32> to vector<16x32xf32>
      %31 = arith.mulf %26, %30 : vector<16x32xf32>
      %32 = vector.broadcast %12 : vector<1x32xf32> to vector<16x32xf32>
      %33 = arith.mulf %31, %32 : vector<16x32xf32>
      %34 = vector.broadcast %13 : vector<1x32xf32> to vector<16x32xf32>
      %35 = arith.addf %33, %34 : vector<16x32xf32>
      %36 = arith.truncf %35 : vector<16x32xf32> to vector<16x32xbf16>
      %c0_17 = arith.constant 0 : index
      %c0_18 = arith.constant 0 : index
      %37 = vector.load %arg7[%c0_17, %c0_18] : memref<16x32xbf16, #tpu.memory_space<vmem>>, vector<16x32xbf16>
      tpu.vector_store %arg7[%c0_17, %c0_18], %36 {strides = array<i32>} : memref<16x32xbf16, #tpu.memory_space<vmem>>, vector<16x32xbf16>,
    } else {
    }
    %c0 = arith.constant 0 : index
    %c0_1 = arith.constant 0 : index
    %3 = vector.load %arg7[%c0, %c0_1] : memref<16x32xbf16, #tpu.memory_space<vmem>>, vector<16x32xbf16>
    %c0_2 = arith.constant 0 : index
    %c0_3 = arith.constant 0 : index
    %4 = vector.load %arg4[%c0_2, %c0_3] : memref<32x64xbf16, #tpu.memory_space<vmem>>, vector<32x64xbf16>
    %cst = arith.constant dense<0.000000e+00> : vector<16x64xf32>
    %5 = tpu.matmul %3, %4, %cst {dimension_numbers = #tpu.dot_dimension_numbers<[1], [0], [0], [1], [0, 0, 1, 1], [], []>} : vector<16x32xbf16>, vector<32x64xbf16>, vector<16x64xf32> -> vector<16x64xf32>
    %c0_4 = arith.constant 0 : index
    %c0_5 = arith.constant 0 : index
    %6 = vector.load %arg5[%c0_4, %c0_5] : memref<1x64xf32, #tpu.memory_space<vmem>>, vector<1x64xf32>
    %7 = vector.broadcast %6 : vector<1x64xf32> to vector<16x64xf32>
    %8 = arith.addf %5, %7 : vector<16x64xf32>
    %c0_6 = arith.constant 0 : index
    %c0_7 = arith.constant 0 : index
    %9 = vector.load %arg6[%c0_6, %c0_7] : memref<16x64xf32, #tpu.memory_space<vmem>>, vector<16x64xf32>
    tpu.vector_store %arg6[%c0_6, %c0_7], %8 {strides = array<i32>} : memref<16x64xf32, #tpu.memory_space<vmem>>, vector<16x64xf32>,
    return
  }
  func.func @transform_0(%arg0: i32, %arg1: i32) -> (i32, i32) {
    %c0_i32 = arith.constant 0 : i32
    %c0_i32_0 = arith.constant 0 : i32
    return %arg0, %c0_i32 : i32, i32
  }
  func.func @transform_1(%arg0: i32, %arg1: i32) -> (i32, i32) {
    %c0_i32 = arith.constant 0 : i32
    %c0_i32_0 = arith.constant 0 : i32
    %c0_i32_1 = arith.constant 0 : i32
    return %c0_i32, %c0_i32_0 : i32, i32
  }
  func.func @transform_2(%arg0: i32, %arg1: i32) -> (i32, i32) {
    %c0_i32 = arith.constant 0 : i32
    %c0_i32_0 = arith.constant 0 : i32
    return %c0_i32, %arg1 : i32, i32
  }
  func.func @transform_3(%arg0: i32, %arg1: i32) -> (i32, i32) {
    %c0_i32 = arith.constant 0 : i32
    %c0_i32_0 = arith.constant 0 : i32
    return %c0_i32, %arg1 : i32, i32
  }
  func.func @transform_4(%arg0: i32, %arg1: i32) -> (i32, i32) {
    %c0_i32 = arith.constant 0 : i32
    return %arg0, %arg1 : i32, i32
  }
}

</mosaic_0001>

<bundles_post_ra>
// kernel: transformer_forward.7
= control target key start
LH: loop header
LB: loop body
LE: loop exit
PB: predicated region body
PF: predicated region fallthrough
CT: control target
= control target key end

     0   :  { %s896_s21 = smov 0   ;;  %s898_s22 = smov 0   ;;  %s1001_s0 = inlined_call_operand.vmem [shape: f32[2,8,32], index: 0, kind: input, shape index: {}]   ;;  %s1002_s1 = inlined_call_operand.vmem [shape: f32[2,32], index: 1, kind: input, shape index: {}]   ;;  %s1003_s2 = inlined_call_operand.vmem [shape: bf16[4,32,24], index: 2, kind: input, shape index: {}]   ;;  %s1004_s3 = inlined_call_operand.vmem [shape: f32[4,1,24], index: 3, kind: input, shape index: {}]   ;;  %s1005_s4 = inlined_call_operand.vmem [shape: bf16[2,4,8,8], index: 4, kind: output, shape index: {0}]   ;;  %s1006_s5 = inlined_call_operand.vmem [shape: bf16[2,4,8,8], index: 5, kind: output, shape index: {1}]   ;;  %s1007_s6 = inlined_call_operand.vmem [shape: bf16[2,4,8,8], index: 6, kind: output, shape index: {2}]  }
   0x1   :  { %s900_s23 = smov 0   ;;  %s902_s24 = smov 0  }
   0x2   :  { %s904_s25 = smov 0  }
   0x3 LB: > { %s29_s26 = sadd.s32 1, %s847_s23  ;;  %s36_s27 = sadd.s32 1, %s851_s24  ;;  %s855_s25 = sphi %s904_s25, %s17_s25   ;;  %s851_s24 = sphi %s902_s24, %s1011_s24   ;;  %s847_s23 = sphi %s900_s23, %s1010_s23   ;;  %s843_s22 = sphi %s898_s22, %s1009_s22   ;;  %s839_s21 = sphi %s896_s21, %s1008_s21  }
   0x4   : > { %p30_p0 = scmp.ge.s32.totalorder %s29_s26, 4  ;;  %p738_p1 = scmp.ge.s32.totalorder %s855_s25, 1 }
   0x5   : > { %p270_p2 = scmp.lt.s32.totalorder %s855_s25, 9 }
   0x6   : > { %s1013_s26 = smov (%p30_p0, %s29_s26), 0  ;;  %s1015_s27 = smov (!%p30_p0, %s36_s27), %s851_s24 }
   0x7   : > { %p271_p3 = pnand %p738_p1, %p270_p2  ;;  %p38_p4 = scmp.ge.s32.totalorder %s1015_s27, 2 }
   0x8   : > { %p338_p5 = scmp.lt.s32.totalorder (!%p271_p3), %s843_s22, 1  ;;  %p345_p6 = scmp.lt.s32.totalorder (!%p271_p3), %s839_s21, 3 }
   0x9   : > { %s1017_s27 = smov (%p38_p4, %s1015_s27), 0  ;;  %274 = sbr.rel (%p271_p3) target bundleno = 682 (0x2aa), region = 36 }
   0xa   : > { %p748_p7 = scmp.ne.s32.totalorder (!%p271_p3), %s839_s21, 0 }
  0x10   : > { %s1019_s22 = smov (!%p338_p5, %s843_s22), 1  ;;  %vm393_vm0 = vcmask (!%p748_p7), 261120   ;;  %v408_v9 = vlaneseq (!%p748_p7)  ;;  %v391_v13 = vld [vmem:[%s1002_s1] sm:$0x3] (!%p748_p7)  ;;  %vm419_vm1 = vcmask (!%p748_p7), 257024  }
  0x11   : > { %s930_s28 = scalar_select %p345_p6, %s839_s21, 3 }
  0x12   : > { %s739_s29 = sshll.u32 %s1019_s22, 3  ;;  %s742_s30 = sshll.u32 %s1019_s22, 2  ;;  %v409_v11 = vshrl.u32 (!%p748_p7), %v408_v9, 7 }
  0x13   : > { %s344_s9 = scalar_lea.vmem %s1001_s0, %s739_s29  ;;  %s756_s10 = sshll.u32 %s930_s28, 4 }
  0x14   : > { %s939_s13 = scalar_lea.vmem %s1003_s2, %s756_s10  ;;  %s352_s16 = scalar_lea.vmem %s1004_s3, %s930_s28  ;;  %v392_v0 = vld [vmem:[%s344_s9] sm:$0xff] (!%p748_p7)  ;;  %v410_v12 = vsub.s32 (!%p748_p7), 0, %v409_v11  ;;  %v415_v14 = vsub.s32 (!%p748_p7), 1, %v409_v11 }
  0x15   : > { %s361_s17 = sadd.s32 %s742_s30, %s930_s28  ;;  %390 = sbr.rel (%p748_p7) target bundleno = 337 (0x151), region = 40  ;;  %v394_v1 = vsel (!%p748_p7), %vm393_vm0, %v392_v0, 0.0 }
  0x16   : > { %s946_s18 = sshll.u32 %s361_s17, 2  ;;  %395 = vadd.xlane.f32.xlu0 (!%p748_p7), %v394_v1  ;;  %v411_v15 = vrot.slane (!%p748_p7), %v391_v13, %v410_v12  ;;  %v416_v18 = vrot.slane (!%p748_p7), %v391_v13, %v415_v14 }
  0x17   : > { %s363_s22 = scalar_lea.vmem %s1005_s4, %s946_s18  ;;  %s374_s8 = scalar_lea.vmem %s1006_s5, %s946_s18 }
  0x18   : > { %s385_s12 = scalar_lea.vmem %s1007_s6, %s946_s18 }
  0xa3   : > { %v396_v2 = vpop.xlane.xlu0 %395 }
  0xa4   : > { %v398_v3 = vmul.f32 0.03125, %v396_v2 }
  0xa6   : > { %v399_v4 = vsub.f32 %v392_v0, %v398_v3 }
  0xa8   : > { %v400_v5 = vmul.f32 %v399_v4, %v399_v4 }
  0xaa   : > { %v401_v6 = vsel %vm393_vm0, %v400_v5, 0.0 }
  0xab   : > { %402 = vadd.xlane.f32.xlu0 %v401_v6 }
 0x138   : > { %v403_v7 = vpop.xlane.xlu0 %402 }
 0x139   : > { %v404_v8 = vmul.f32 0.03125, %v403_v7 }
 0x13b   : > { %v405_v10 = vadd.f32 1e-05, %v404_v8 }
 0x13d   : > { %813 = vrsqrt.f32 %v405_v10 }
 0x147   : > { %v814_v16 = vpop.eup %813 }
 0x148   : > { %v407_v17 = vmul.f32 %v814_v16, %v399_v4 }
 0x14a   : > { %v412_v19 = vmul.f32 %v411_v15, %v407_v17 }
 0x14c   : > { %v417_v20 = vadd.f32 %v416_v18, %v412_v19 }
 0x14e   : > { %v418_v21 = vpack.c.bf16 %v417_v20, %v417_v20 }
 0x150   : > { %420 = vst.msk [vmem:[#allocation2] sm:$0xf] %vm419_vm1, %v418_v21 }
 0x151 PF: > { %v815_v22 = vld [vmem:[%s939_s13] sm:$0xff]   ;;  %v857_v23 = vmov 0.0   ;;  %v816_v24 = vld [vmem:[%s939_s13 + $0x8] sm:$0xff]   ;;  %vm858_vm2 = vmmov 0   ;;  %vm445_vm3 = vcmask 261120   ;;  %vm490_vm4 = vcmask 60416  }
 0x152   : > { %761 = vmatprep.subr.bf16.mxu0 %v857_v23  ;;  %765 = vmatprep.mubr.msk.bf16.mxu0 %vm858_vm2, %v857_v23  ;;  %v749_v26 = vld [vmem:[%s352_s16] ss:$0 sm:$0xff]  ;;  %s859_s13 = smov 120   ;;  %s860_s19 = smov 112  }
 0x153   : > { %762 = vmatpush3.bf16.msra.mxu0 %v815_v22 }
 0x154   : > { %763 = vmatprep.subr.bf16.mxu0 %v857_v23 }
 0x157   : > { %764 = vmatpush3.bf16.msra.mxu0 %v816_v24  ;;  %v421_v25 = vld [vmem:[#allocation2] sm:$0xf] }
 0x15a   : > { %766 = vmatmul.mubr.msk.bf16.vlgmr.msra.gmra.mrb[0].mxu0 %vm445_vm3, %v421_v25 }
 0x22d   : > { %v483_v27 = vpop.f32.mrb[0].mxu0 }
 0x22e   : > { %v484_v28 = vadd.f32 %v749_v26, %v483_v27  ;;  %v767_v29 = vpop.f32.mrb[1].mxu0 }
 0x22f   : > { %v486_v30 = vpop.f32.mrb[2].mxu0 }
 0x230   : > { %v489_v31 = vpack.c.bf16 %v484_v28, %v484_v28  ;;  %v768_v32 = vpop.f32.mrb[3].mxu0 }
 0x232   : > { %495 = vrot.lane.b32.xlu0 %v489_v31, %s859_s13  ;;  %491 = vst.msk [vmem:[%s363_s22] sm:$0xf] %vm490_vm4, %v489_v31 }
 0x236   : > { %499 = vrot.lane.b32.xlu0 %v489_v31, %s860_s19 }
 0x2a4   : > { %v496_v33 = vpop.permute.xlu0 %495 }
 0x2a5   : > { %498 = vst.msk [vmem:[%s374_s8] sm:$0xf] %vm490_vm4, %v496_v33 }
 0x2a8   : > { %v500_v34 = vpop.permute.xlu0 %499 }
 0x2a9   : > { %502 = vst.msk [vmem:[%s385_s12] sm:$0xf] %vm490_vm4, %v500_v34 }
 0x2aa PF: > { %s17_s25 = sadd.s32 1, %s855_s25   ;;  %s1008_s21 = smov %s847_s23 }
 0x2ab   : > { %p14_p8 = scmp.ge.s32.totalorder %s17_s25, 10   ;;  %s1009_s22 = smov %s851_s24 }
 0x2ac   : > { %s1010_s23 = smov %s1013_s26  ;;  %s1011_s24 = smov %s1017_s27 }
 0x2ad   :  { %16 = sbr.rel (!%p14_p8) target bundleno = 3 (0x3), region = 100 }

// kernel: transformer_forward.13
= control target key start
LH: loop header
LB: loop body
LE: loop exit
PB: predicated region body
PF: predicated region fallthrough
CT: control target
= control target key end

     0   :  { %vm26_vm0 = vcmask 261120   ;;  %s272_s0 = inlined_call_operand.vmem [shape: f32[16,32], index: 0, kind: input, shape index: {}]   ;;  %s273_s1 = inlined_call_operand.vmem [shape: f32[2,32], index: 1, kind: input, shape index: {}]   ;;  %s274_s2 = inlined_call_operand.vmem [shape: bf16[32,64], index: 2, kind: input, shape index: {}]   ;;  %s275_s3 = inlined_call_operand.vmem [shape: f32[1,64], index: 3, kind: input, shape index: {}]   ;;  %s276_s4 = inlined_call_operand.hbm [shape: f32[16,64], index: 4, kind: output, shape index: {}]  }
   0x1   :  { %v24_v0 = vld [vmem:[%s272_s0] sm:$0xff]  ;;  %v25_v1 = vld [vmem:[%s272_s0 + $0x8] sm:$0xff] }
   0x2   :  { %v27_v2 = vsel %vm26_vm0, %v24_v0, 0.0 }
   0x3   :  { %28 = vadd.xlane.f32.xlu0 %v27_v2 }
   0x4   :  { %9 = vsyncpa [#allocation4], 0  ;;  %v30_v3 = vsel %vm26_vm0, %v25_v1, 0.0  ;;  %v176_v14 = vld [vmem:[%s274_s2] sm:$0xff]   ;;  %v206_v15 = vmov 0.0   ;;  %v177_v16 = vld [vmem:[%s274_s2 + $0x8] sm:$0xff]   ;;  %v54_v20 = vlaneseq }
   0x5   :  { %163 = vmatprep.subr.bf16.mxu0 %v206_v15  ;;  %vm207_vm1 = vmmov 0   ;;  %v23_v26 = vld [vmem:[%s273_s1] sm:$0x3]  ;;  %s208_s1 = smov [#allocation3]   ;;  %vm137_vm2 = vcmask 523264  }
   0x6   :  { %164 = vmatpush3.bf16.msra.mxu0 %v176_v14  ;;  %167 = vmatprep.mubr.msk.bf16.mxu0 %vm207_vm1, %v206_v15  ;;  %v55_v24 = vshrl.u32 %v54_v20, 7  ;;  %v156_v40 = vld [vmem:[%s275_s3] ss:$0 sm:$0xff]  ;;  %s145_s25 = sshll.u32 %s208_s1, 4  ;;  %s146_s25 = int_to_ptr.vmem [resolvable:$true] %s145_s25 }
   0x7   :  { %31 = vadd.xlane.f32.xlu0 %v30_v3  ;;  %165 = vmatprep.subr.bf16.mxu0 %v206_v15  ;;  %s182_s26 = scalar_lea.vmem %s146_s25, 256  ;;  %p187_p1 = scmp.lt.s32.totalorder %s146_s25, %s146_s25 }
   0x8   :  { %v56_v25 = vsub.s32 0, %v55_v24  ;;  %v62_v28 = vsub.s32 1, %v55_v24  ;;  %p183_p0 = scmp.ne.s32.totalorder %s146_s25, %s182_s26  ;;  %p188_p2 = scmp.lt.s32.totalorder %s182_s26, %s182_s26 }
   0xa   :  { %166 = vmatpush3.bf16.msra.mxu0 %v177_v16  ;;  %v57_v30 = vrot.slane %v23_v26, %v56_v25  ;;  %v63_v33 = vrot.slane %v23_v26, %v62_v28  ;;  %p189_p3 = por %p188_p2, %p187_p1 }
   0xc   :  { %p190_p4 = pnand %p189_p3, %p183_p0 }
  0x90   :  { %v29_v4 = vpop.xlane.xlu0 %28 }
  0x91   :  { %v34_v5 = vmul.f32 0.03125, %v29_v4 }
  0x93   :  { %v36_v6 = vsub.f32 %v24_v0, %v34_v5 }
  0x94   :  { %v32_v7 = vpop.xlane.xlu0 %31 }
  0x95   :  { %v35_v8 = vmul.f32 0.03125, %v32_v7  ;;  %v38_v9 = vmul.f32 %v36_v6, %v36_v6 }
  0x97   :  { %v37_v10 = vsub.f32 %v25_v1, %v35_v8  ;;  %v40_v11 = vsel %vm26_vm0, %v38_v9, 0.0 }
  0x98   :  { %41 = vadd.xlane.f32.xlu1 %v40_v11 }
  0x99   :  { %v39_v12 = vmul.f32 %v37_v10, %v37_v10 }
  0x9b   :  { %v43_v13 = vsel %vm26_vm0, %v39_v12, 0.0 }
  0x9c   :  { %44 = vadd.xlane.f32.xlu1 %v43_v13 }
 0x125   :  { %v42_v17 = vpop.xlane.xlu1 %41 }
 0x126   :  { %v46_v18 = vmul.f32 0.03125, %v42_v17 }
 0x128   :  { %v48_v19 = vadd.f32 1e-05, %v46_v18 }
 0x129   :  { %v45_v21 = vpop.xlane.xlu1 %44 }
 0x12a   :  { %178 = vrsqrt.f32 %v48_v19  ;;  %v47_v22 = vmul.f32 0.03125, %v45_v21 }
 0x12c   :  { %v49_v23 = vadd.f32 1e-05, %v47_v22 }
 0x12e   :  { %180 = vrsqrt.f32 %v49_v23 }
 0x134   :  { %v179_v27 = vpop.eup %178 }
 0x135   :  { %v52_v29 = vmul.f32 %v179_v27, %v36_v6 }
 0x137   :  { %v58_v32 = vmul.f32 %v57_v30, %v52_v29 }
 0x138   :  { %v181_v31 = vpop.eup %180 }
 0x139   :  { %v53_v34 = vmul.f32 %v181_v31, %v37_v10  ;;  %v64_v36 = vadd.f32 %v63_v33, %v58_v32 }
 0x13b   :  { %v59_v35 = vmul.f32 %v57_v30, %v53_v34 }
 0x13d   :  { %v65_v37 = vadd.f32 %v63_v33, %v59_v35 }
 0x13f   :  { %v66_v38 = vpack.c.bf16 %v65_v37, %v64_v36 }
 0x141   :  { %67 = vst.msk [vmem:[#allocation2] sm:$0xff] %vm26_vm0, %v66_v38 }
 0x148   :  { %v68_v39 = vld [vmem:[#allocation2] sm:$0xff] }
 0x149   :  { %168 = vmatmul.mubr.msk.bf16.vlgmr.msra.gmra.mrb[0].mxu0 %vm26_vm0, %v68_v39 }
 0x21c   :  { %v130_v41 = vpop.f32.mrb[0].mxu0 }
 0x21d   :  { %v131_v42 = vadd.f32 %v156_v40, %v130_v41  ;;  %v169_v43 = vpop.f32.mrb[1].mxu0 }
 0x21e   :  { %v133_v44 = vpop.f32.mrb[2].mxu0 }
 0x21f   :  { %138 = vst.msk [vmem:[#allocation3] sm:$0xff] %vm137_vm2, %v131_v42  ;;  %v134_v45 = vadd.f32 %v156_v40, %v133_v44  ;;  %v170_v46 = vpop.f32.mrb[3].mxu0 }
 0x221   :  { %139 = vst.msk [vmem:[#allocation3 + $0x8] sm:$0xff] %vm137_vm2, %v134_v45 }
 0x222   :  { %193 = shalt.err (!%p190_p4)
}
 0x223   :  { %s194_s28 = scalar_lea.hbm %s276_s4, 256 }
 0x224   :  { %p195_p5 = scmp.ne.s32.totalorder %s276_s4, %s194_s28  ;;  %p198_p6 = scmp.lt.u32.totalorder %s194_s28, %s276_s4 }
 0x226   :  { %p200_p7 = pnand %p198_p6, %p195_p5 }
 0x228   :  { %203 = shalt.err (!%p200_p7)
}
 0x229   :  { %s209_s7 = smov 128   ;;  %s210_s8 = smov 8  }
 0x22a   :  { %151 = dma.vmem_to_hbm [thread:$0]  %s146_s25, 256, %s276_s4, [#allocation4], %s209_s7, %s209_s7, %s210_s8  }
 0x22b   :  { %204 = dma.done.wait [#allocation4], 256  }
 0x22c   :  { %205 = vsyncadd [#allocation4], 4294967040 }
 0x22d   :  { %155 = vsyncpa [#allocation4], 1 }

// kernel: transformer_forward.9
= control target key start
LH: loop header
LB: loop body
LE: loop exit
PB: predicated region body
PF: predicated region fallthrough
CT: control target
= control target key end

     0   :  { %s941_s24 = smov 0   ;;  %s943_s25 = smov 0   ;;  %s1018_s0 = inlined_call_operand.vmem [shape: f32[2,8,32], index: 0, kind: input, shape index: {}]   ;;  %s1019_s1 = inlined_call_operand.vmem [shape: bf16[2,4,8,8], index: 1, kind: input, shape index: {}]   ;;  %s1020_s2 = inlined_call_operand.vmem [shape: f32[2,32], index: 2, kind: input, shape index: {}]   ;;  %s1021_s3 = inlined_call_operand.vmem [shape: bf16[32,64], index: 3, kind: input, shape index: {}]   ;;  %s1022_s4 = inlined_call_operand.vmem [shape: f32[1,64], index: 4, kind: input, shape index: {}]   ;;  %s1023_s5 = inlined_call_operand.vmem [shape: bf16[64,32], index: 5, kind: input, shape index: {}]   ;;  %s1024_s6 = inlined_call_operand.vmem [shape: f32[1,32], index: 6, kind: input, shape index: {}]   ;;  %s1025_s7 = inlined_call_operand.vmem [shape: f32[2,8,32], index: 7, kind: output, shape index: {}]  }
   0x1   :  { %s945_s26 = smov 0  }
   0x2 LB: > { %s36_s27 = sadd.s32 1, %s890_s25  ;;  %p778_p0 = scmp.ge.s32.totalorder %s894_s26, 1  ;;  %s894_s26 = sphi %s945_s26, %s17_s26   ;;  %s890_s25 = sphi %s943_s25, %s1027_s25   ;;  %s886_s24 = sphi %s941_s24, %s1026_s24  }
   0x3   : > { %p38_p1 = scmp.ge.s32.totalorder %s36_s27, 2  ;;  %p305_p2 = scmp.lt.s32.totalorder %s894_s26, 3 }
   0x5   : > { %s1029_s27 = smov (%p38_p1, %s36_s27), 0  ;;  %p306_p3 = pnand %p778_p0, %p305_p2 }
   0x6   : > { %p361_p4 = scmp.lt.s32.totalorder (!%p306_p3), %s886_s24, 1  ;;  %s896_s9 = smov (!%p306_p3), 8   ;;  %vm423_vm0 = vcmask (!%p306_p3), 64512   ;;  %vm427_vm1 = vcmask (!%p306_p3), 130048   ;;  %vm430_vm2 = vcmask (!%p306_p3), 195584   ;;  %vm438_vm3 = vcmask (!%p306_p3), 261120  }
   0x7   : > { %309 = sbr.rel (%p306_p3) target bundleno = 922 (0x39a), region = 48  ;;  %s897_s10 = smov (!%p306_p3), 24   ;;  %v789_v12 = vld [vmem:[%s1024_s6] ss:$0 sm:$0xff] (!%p306_p3)  ;;  %v899_v22 = vmov (!%p306_p3), 0.0   ;;  %v863_v23 = vld [vmem:[%s1021_s3 + $0x8] sm:$0xff] (!%p306_p3)   ;;  %v453_v26 = vlaneseq (!%p306_p3) }
   0x8   : > { %s898_s11 = smov (!%p306_p3), 16   ;;  %v862_v21 = vld [vmem:[%s1021_s3] sm:$0xff] (!%p306_p3)   ;;  %810 = vmatprep.subr.bf16.mxu0 (!%p306_p3), %v899_v22  ;;  %818 = vmatprep.subr.bf16.mxu1 (!%p306_p3), %v899_v22  ;;  %vm900_vm4 = vmmov (!%p306_p3), 0   ;;  %vm464_vm5 = vcmask (!%p306_p3), 257024   ;;  %v865_v41 = vld [vmem:[%s1023_s5 + $0x8] sm:$0xff] (!%p306_p3)   ;;  %v866_v42 = vld [vmem:[%s1023_s5 + $0x10] sm:$0xff] (!%p306_p3)  }
   0x9   : > { %811 = vmatpush3.bf16.msra.mxu0 (!%p306_p3), %v862_v21  ;;  %814 = vmatprep.mubr.msk.bf16.mxu0 (!%p306_p3), %vm900_vm4, %v899_v22  ;;  %v454_v28 = vshrl.u32 (!%p306_p3), %v453_v26, 7  ;;  %v437_v30 = vld [vmem:[%s1020_s2] sm:$0x3] (!%p306_p3)  ;;  %v867_v43 = vld [vmem:[%s1023_s5 + $0x18] sm:$0xff] (!%p306_p3)   ;;  %vm582_vm6 = vcmask (!%p306_p3), 523264  }
   0xa   : > { %812 = vmatprep.subr.bf16.mxu0 (!%p306_p3), %v899_v22  ;;  %826 = vmatprep.mubr.msk.bf16.mxu1 (!%p306_p3), %vm900_vm4, %v899_v22  ;;  %v864_v40 = vld [vmem:[%s1023_s5] sm:$0xff] (!%p306_p3)  }
   0xb   : > { %v455_v29 = vsub.s32 (!%p306_p3), 0, %v454_v28  ;;  %v460_v31 = vsub.s32 (!%p306_p3), 1, %v454_v28  ;;  %819 = vmatpush3.bf16.msra.mxu1 (!%p306_p3), %v864_v40  ;;  %v790_v44 = vld [vmem:[%s1022_s4] ss:$0 sm:$0xff] (!%p306_p3) }
   0xc   : > { %820 = vmatprep.subr.bf16.mxu1 (!%p306_p3), %v899_v22 }
   0xd   : > { %813 = vmatpush3.bf16.msra.mxu0 (!%p306_p3), %v863_v23  ;;  %v456_v32 = vrot.slane (!%p306_p3), %v437_v30, %v455_v29  ;;  %v461_v34 = vrot.slane (!%p306_p3), %v437_v30, %v460_v31 }
   0xe   : > { %s1031_s24 = smov (!%p361_p4, %s886_s24), 1 }
   0xf   : > { %s801_s28 = sshll.u32 %s1031_s24, 4  ;;  %s779_s12 = sshll.u32 %s1031_s24, 3  ;;  %821 = vmatpush3.bf16.msra.mxu1 %v865_v41 }
  0x10   : > { %s375_s8 = scalar_lea.vmem %s1019_s1, %s801_s28  ;;  %s367_s15 = scalar_lea.vmem %s1018_s0, %s779_s12  ;;  %822 = vmatprep.subr.bf16.mxu1 %v899_v22 }
  0x11   : > { %v859_v0 = vld [vmem:[%s375_s8 + $0x4] ss:$0 sps:$4 sm:$0xff]   ;;  %v861_v1 = vld [vmem:[%s375_s8 + $0xc] ss:$0 sps:$4 sm:$0xff]   ;;  %v860_v2 = vld [vmem:[%s375_s8 + $0x8] ss:$0 sps:$4 sm:$0xff]   ;;  %s395_s18 = scalar_lea.vmem %s1025_s7, %s779_s12 }
  0x12   : > { %411 = vrot.lane.b32.xlu0 %v859_v0, %s896_s9  ;;  %421 = vrot.lane.b32.xlu1 %v861_v1, %s897_s10  ;;  %v401_v4 = vld [vmem:[%s375_s8] sm:$0xf] }
  0x13   : > { %v435_v10 = vld [vmem:[%s367_s15] sm:$0xff]  ;;  %823 = vmatpush3.bf16.msra.mxu1 %v866_v42 }
  0x14   : > { %824 = vmatprep.subr.bf16.mxu1 %v899_v22 }
  0x16   : > { %416 = vrot.lane.b32.xlu0 %v860_v2, %s898_s11 }
  0x17   : > { %825 = vmatpush3.bf16.msra.mxu1 %v867_v43 }
  0x84   : > { %v412_v3 = vpop.permute.xlu0 %411  ;;  %v422_v5 = vpop.permute.xlu1 %421 }
  0x85   : > { %v426_v6 = vsel %vm423_vm0, %v401_v4, %v412_v3 }
  0x88   : > { %v417_v7 = vpop.permute.xlu0 %416 }
  0x89   : > { %v429_v8 = vsel %vm427_vm1, %v426_v6, %v417_v7 }
  0x8a   : > { %v432_v9 = vsel %vm430_vm2, %v429_v8, %v422_v5 }
  0x8b   : > { %v434_v11 = vunpack.c.l.bf16 %v432_v9 }
  0x8d   : > { %v436_v13 = vadd.f32 %v435_v10, %v434_v11 }
  0x8f   : > { %v473_v14 = vadd.f32 %v789_v12, %v436_v13  ;;  %v439_v15 = vsel %vm438_vm3, %v436_v13, 0.0 }
  0x90   : > { %440 = vadd.xlane.f32.xlu1 %v439_v15 }
  0x91   : > { %474 = vst.msk [vmem:[#allocation2] sm:$0xff] %vm438_vm3, %v473_v14 }
  0x98   : > { %v549_v56 = vld [vmem:[#allocation2] sm:$0xff] }
 0x11d   : > { %v441_v16 = vpop.xlane.xlu1 %440 }
 0x11e   : > { %v443_v17 = vmul.f32 0.03125, %v441_v16 }
 0x120   : > { %v444_v18 = vsub.f32 %v436_v13, %v443_v17 }
 0x122   : > { %v445_v19 = vmul.f32 %v444_v18, %v444_v18 }
 0x124   : > { %v446_v20 = vsel %vm438_vm3, %v445_v19, 0.0 }
 0x125   : > { %447 = vadd.xlane.f32.xlu0 %v446_v20 }
 0x1b2   : > { %v448_v24 = vpop.xlane.xlu0 %447 }
 0x1b3   : > { %v449_v25 = vmul.f32 0.03125, %v448_v24 }
 0x1b5   : > { %v450_v27 = vadd.f32 1e-05, %v449_v25 }
 0x1b7   : > { %868 = vrsqrt.f32 %v450_v27 }
 0x1c1   : > { %v869_v33 = vpop.eup %868 }
 0x1c2   : > { %v452_v35 = vmul.f32 %v869_v33, %v444_v18 }
 0x1c4   : > { %v457_v36 = vmul.f32 %v456_v32, %v452_v35 }
 0x1c6   : > { %v462_v37 = vadd.f32 %v461_v34, %v457_v36 }
 0x1c8   : > { %v463_v38 = vpack.c.bf16 %v462_v37, %v462_v37 }
 0x1ca   : > { %465 = vst.msk [vmem:[#allocation3] sm:$0xf] %vm464_vm5, %v463_v38 }
 0x1d1   : > { %v475_v39 = vld [vmem:[#allocation3] sm:$0xf] }
 0x1d2   : > { %815 = vmatmul.mubr.msk.bf16.vlgmr.msra.gmra.mrb[0].mxu0 %vm438_vm3, %v475_v39 }
 0x2a5   : > { %v537_v45 = vpop.f32.mrb[0].mxu0 }
 0x2a6   : > { %v538_v46 = vadd.f32 %v790_v44, %v537_v45  ;;  %v816_v47 = vpop.f32.mrb[1].mxu0 }
 0x2a7   : > { %v540_v48 = vpop.f32.mrb[2].mxu0 }
 0x2a8   : > { %v544_v49 = vmul.f32 0.70710677, %v538_v46  ;;  %v817_v50 = vpop.f32.mrb[3].mxu0  ;;  %v543_v52 = vmul.f32 0.5, %v538_v46 }
 0x2aa   : > { %870 = verf.f32 %v544_v49 }
 0x2b4   : > { %v871_v51 = vpop.eup %870 }
 0x2b5   : > { %v546_v53 = vadd.f32 1.0, %v871_v51 }
 0x2b7   : > { %v547_v54 = vmul.f32 %v546_v53, %v543_v52 }
 0x2b9   : > { %v548_v55 = vpack.c.bf16 %v547_v54, %v547_v54 }
 0x2bb   : > { %827 = vmatmul.mubr.msk.bf16.vlgmr.msra.gmra.mrb[0].mxu1 %vm582_vm6, %v548_v55 }
 0x38e   : > { %v620_v57 = vpop.f32.mrb[0].mxu1 }
 0x38f   : > { %v626_v58 = vadd.f32 %v620_v57, %v549_v56  ;;  %v828_v59 = vpop.f32.mrb[1].mxu1 }
 0x390   : > { %v623_v60 = vpop.f32.mrb[2].mxu1 }
 0x391   : > { %627 = vst.msk [vmem:[#allocation2] sm:$0xff] %vm438_vm3, %v626_v58  ;;  %v829_v61 = vpop.f32.mrb[3].mxu1 }
 0x398   : > { %v631_v62 = vld [vmem:[#allocation2] sm:$0xff] }
 0x399   : > { %632 = vst.msk [vmem:[%s395_s18] sm:$0xff] %vm438_vm3, %v631_v62 }
 0x39a PF: > { %s17_s26 = sadd.s32 1, %s894_s26   ;;  %s1026_s24 = smov %s890_s25 }
 0x39b   : > { %p14_p5 = scmp.ge.s32.totalorder %s17_s26, 4   ;;  %s1027_s25 = smov %s1029_s27 }
 0x39d   :  { %16 = sbr.rel (!%p14_p5) target bundleno = 2 (0x2), region = 101 }

// kernel: transformer_forward.8
= control target key start
LH: loop header
LB: loop body
LE: loop exit
PB: predicated region body
PF: predicated region fallthrough
CT: control target
= control target key end

     0   :  { %s902_s0 = inlined_call_operand.vmem [shape: s32[2,1], index: 0, kind: input, shape index: {}]   ;;  %s903_s1 = inlined_call_operand.vmem [shape: bf16[8,8,8], index: 1, kind: input, shape index: {}]   ;;  %s904_s2 = inlined_call_operand.vmem [shape: bf16[8,8,8], index: 2, kind: input, shape index: {}]   ;;  %s905_s3 = inlined_call_operand.vmem [shape: bf16[8,8,8], index: 3, kind: input, shape index: {}]   ;;  %s906_s4 = inlined_call_operand.vmem [shape: bf16[8,8,8], index: 4, kind: output, shape index: {}]  }
   0x1   :  { %s9_s17 = sshll.u32 %s902_s0, 4  ;;  %s10_s17 = int_to_ptr.vmem [resolvable:$true] %s9_s17 }
   0x2   :  { %s751_s18 = scalar_lea.vmem %s10_s17, 32  ;;  %p756_p1 = scmp.lt.s32.totalorder %s10_s17, %s10_s17 }
   0x3   :  { %p752_p0 = scmp.ne.s32.totalorder %s10_s17, %s751_s18  ;;  %p757_p2 = scmp.lt.s32.totalorder %s751_s18, %s751_s18 }
   0x5   :  { %p758_p3 = por %p757_p2, %p756_p1 }
   0x7   :  { %p759_p4 = pnand %p758_p3, %p752_p0 }
   0x9   :  { %762 = shalt.err (!%p759_p4)  }
   0xa   :  { %s789_s19 = smov [#allocation6]  }
   0xb   :  { %12 = dma.vmem_to_smem %s10_s17, 32, %s789_s19, [#allocation5] }
   0xc   :  { %775 = dma.done.wait [#allocation5], 32 }
   0xd   :  { %776 = vsyncadd [#allocation5], 4294967264 }
   0xe   :  { %14 = sfence }
   0xf   :  { %s824_s20 = smov 0   ;;  %s826_s21 = smov 0  }
  0x10   :  { %s828_s22 = smov 0  }
  0x11 LB: > { %s32_s0 = sadd.s32 1, %s783_s21  ;;  %p679_p5 = scmp.ge.s32.totalorder %s787_s22, 1  ;;  %s787_s22 = sphi %s828_s22, %s20_s22   ;;  %s783_s21 = sphi %s826_s21, %s908_s21   ;;  %s779_s20 = sphi %s824_s20, %s907_s20  }
  0x12   : > { %p34_p6 = scmp.ge.s32.totalorder %s32_s0, 8  ;;  %p260_p7 = scmp.lt.s32.totalorder %s787_s22, 9 }
  0x14   : > { %s910_s0 = smov (%p34_p6, %s32_s0), 0  ;;  %p261_p8 = pnand %p679_p5, %p260_p7 }
  0x15   : > { %s842_s23 = sld [smem:[#allocation6]] (!%p261_p8)  ;;  %p321_p9 = scmp.lt.s32.totalorder (!%p261_p8), %s779_s20, 7 }
  0x16   : > { %264 = sbr.rel (%p261_p8) target bundleno = 846 (0x34e), region = 32  ;;  %s844_s24 = sld [smem:[#allocation6 + $0x80]] (!%p261_p8) }
  0x1b   : > { %p323_p10 = scmp.lt.s32.totalorder (!%p261_p8), %s842_s23, 0 }
  0x1c   : > { %p339_p11 = scmp.lt.s32.totalorder (!%p261_p8), %s844_s24, 0  ;;  %p687_p12 = scmp.ne.s32.totalorder (!%p261_p8), %s844_s24, 0 }
  0x1d   : > { %s912_s20 = smov (!%p321_p9, %s779_s20), 7  ;;  %vm398_vm0 = vcmask (!%p687_p12), 7168   ;;  %vm401_vm1 = vcmask (!%p687_p12), 64512   ;;  %v790_v0 = vmov (!%p687_p12), -1e+30   ;;  %v791_v1 = vmov (!%p687_p12), 0.0  }
  0x1e   : > { %s324_s25 = scalar_select %p323_p10, %s842_s23, 0 }
  0x1f   : > { %s340_s26 = scalar_select %p339_p11, %s844_s24, 0 }
  0x20   : > { %s325_s27 = sadd.s32 %s324_s25, %s912_s20  ;;  %397 = sbr.rel (%p687_p12) target bundleno = 39 (0x27), region = 36  ;;  %399 = vst.msk [vmem:[#allocation2] sm:$0xff] (!%p687_p12), %vm398_vm0, %v790_v0  ;;  %400 = vst.msk [vmem:[#allocation3] sm:$0xff] (!%p687_p12), %vm398_vm0, %v791_v1 }
  0x21   : > { %s850_s28 = sshll.u32 %s325_s27, 2  ;;  %s341_s29 = sadd.s32 %s340_s26, %s912_s20  ;;  %402 = vst.msk [vmem:[#allocation4] sm:$0xff] (!%p687_p12), %vm401_vm1, %v791_v1 }
  0x22   : > { %s327_s6 = scalar_lea.vmem %s903_s1, %s850_s28  ;;  %s856_s7 = sshll.u32 %s341_s29, 2 }
  0x23   : > { %s343_s10 = scalar_lea.vmem %s904_s2, %s856_s7  ;;  %s366_s13 = scalar_lea.vmem %s905_s3, %s856_s7 }
  0x24   : > { %s382_s16 = scalar_lea.vmem %s906_s4, %s850_s28 }
  0x27 PF: > { %v404_v2 = vld [vmem:[%s343_s10] sm:$0xf]  ;;  %vm406_vm2 = vcmask 64512   ;;  %v792_v3 = vmov 0.0   ;;  %vm793_vm3 = vmmov 0   ;;  %v454_v6 = vlaneseq  ;;  %s689_s17 = sshll.u32 %s842_s23, 3  ;;  %p692_p13 = scmp.ne.s32.totalorder %s844_s24, %s842_s23 }
  0x28   : > { %699 = vmatprep.subr.bf16.mxu0 %v792_v3  ;;  %v411_v4 = vsel %vm406_vm2, %v404_v2, 0  ;;  %701 = vmatprep.mubr.msk.bf16.mxu0 %vm793_vm3, %v792_v3  ;;  %v403_v5 = vld [vmem:[%s327_s6] sm:$0xf]  ;;  %s690_s18 = sshll.u32 %s844_s24, 3  ;;  %v456_v9 = vstv %s689_s17  ;;  %v794_v19 = vmov 0   ;;  %vm487_vm5 = vcmask 7168  }
  0x29   : > { %700 = vmatpush3.bf16.xpose.msra.mxu0 %v411_v4  ;;  %705 = vmatprep.subr.bf16.mxu1 %v792_v3  ;;  %v455_v7 = vshrl.u32 %v454_v6, 7  ;;  %v460_v8 = vand.u32 127, %v454_v6  ;;  %v461_v10 = vstv %s690_s18  ;;  %v465_v20 = vld [vmem:[#allocation2] sm:$0xff]  ;;  %vm500_vm6 = vcmask 1043456   ;;  %v481_v34 = vld [vmem:[#allocation3] sm:$0xff]  ;;  %v489_v38 = vld [vmem:[#allocation4] sm:$0xff] }
  0x2a   : > { %707 = vmatprep.mubr.msk.bf16.mxu1 %vm793_vm3, %v792_v3  ;;  %742 = vset.pattern.permute.xlu0 %v794_v19  ;;  %v405_v24 = vld [vmem:[%s366_s13] sm:$0xf]  ;;  %v795_v47 = vmov (!%p692_p13), 0   ;;  %vm561_vm7 = vcmask (!%p692_p13), 60416  }
  0x2b   : > { %v457_v11 = vadd.s32 %v456_v9, %v455_v7  ;;  %v462_v12 = vadd.s32 %v461_v10, %v460_v8  ;;  %743 = vset.pattern.permute.xlu1 %v794_v19  ;;  %v502_v25 = vsel %vm500_vm6, %v405_v24, 0 }
  0x2c   : > { %706 = vmatpush3.bf16.msra.mxu1 %v502_v25 }
  0x2d   : > { %vm463_vm4 = vcmp.ge.s32.totalorder %v457_v11, %v462_v12 }
  0x30   : > { %702 = vmatmul.mubr.msk.bf16.vlgmr.msra.gmra.mrb[0].mxu0 %vm406_vm2, %v403_v5 }
 0x103   : > { %v447_v13 = vpop.f32.mrb[0].mxu0 }
 0x104   : > { %v464_v14 = vsel %vm463_vm4, %v447_v13, -1e+30  ;;  %v703_v15 = vpop.f32.mrb[1].mxu0 }
 0x105   : > { %v450_v16 = vpop.f32.mrb[2].mxu0  ;;  %v466_v17 = vsel %vm406_vm2, %v464_v14, -inf }
 0x106   : > { %467 = vmax.xlane.f32.xlu0 %v466_v17  ;;  %v704_v18 = vpop.f32.mrb[3].mxu0 }
 0x193   : > { %v468_v21 = vpop.xlane.xlu0 %467 }
 0x194   : > { %v469_v22 = vmax.f32 %v465_v20, %v468_v21 }
 0x196   : > { %v470_v23 = vsub.f32 %v465_v20, %v469_v22  ;;  %546 = vst.msk [vmem:[#allocation2] sm:$0xff] %vm487_vm5, %v469_v22  ;;  %475 = vperm.xlu0 %742, %v469_v22  }
 0x198   : > { %v471_v32 = vmul.f32 1.442695, %v470_v23 }
 0x19a   : > { %748 = vset.pattern.permute.xlu0 (!%p692_p13), %v795_v47 }
 0x215   : > { %v476_v26 = vpop.permute.xlu0 %475 }
 0x216   : > { %v478_v27 = vsub.f32 %v464_v14, %v476_v26 }
 0x218   : > { %v479_v28 = vmul.f32 1.442695, %v478_v27 }
 0x21a   : > { %744 = vpow2.f32 %v479_v28 }
 0x21b   : > { %746 = vpow2.f32 %v471_v32 }
 0x224   : > { %v745_v29 = vpop.eup %744 }
 0x225   : > { %v483_v30 = vsel %vm406_vm2, %v745_v29, 0.0  ;;  %v496_v31 = vpack.c.bf16 %v745_v29, %v745_v29  ;;  %v747_v33 = vpop.eup %746 }
 0x226   : > { %484 = vadd.xlane.f32.xlu1 %v483_v30  ;;  %v482_v35 = vmul.f32 %v747_v33, %v481_v34 }
 0x227   : > { %708 = vmatmul.mubr.msk.bf16.vlgmr.msra.gmra.mrb[0].mxu1 %vm406_vm2, %v496_v31 }
 0x237   : > { %492 = vperm.xlu1 %743, %v747_v33  }
 0x2b3   : > { %v485_v36 = vpop.xlane.xlu1 %484 }
 0x2b4   : > { %v486_v37 = vadd.f32 %v485_v36, %v482_v35 }
 0x2b6   : > { %488 = vst.msk [vmem:[#allocation3] sm:$0xff] %vm487_vm5, %v486_v37 }
 0x2b7   : > { %v493_v39 = vpop.permute.xlu1 %492 }
 0x2b8   : > { %v495_v40 = vmul.f32 %v493_v39, %v489_v38 }
 0x2bd   : > { %v552_v46 = vld [vmem:[#allocation3] sm:$0xff] (!%p692_p13) }
 0x2be   : > { %749 = vrcp.f32 (!%p692_p13), %v552_v46 }
 0x2c8   : > { %v750_v48 = vpop.eup (!%p692_p13), %749 }
 0x2c9   : > { %556 = vperm.xlu0 (!%p692_p13), %748, %v750_v48  }
 0x2f7   : > { %550 = sbr.rel (%p692_p13) target bundleno = 846 (0x34e), region = 40 }
 0x2fa   : > { %v538_v41 = vpop.f32.mrb[0].mxu1 }
 0x2fb   : > { %v544_v42 = vadd.f32 %v538_v41, %v495_v40  ;;  %v709_v43 = vpop.f32.mrb[1].mxu1 }
 0x2fc   : > { %v541_v44 = vpop.f32.mrb[2].mxu1 }
 0x2fd   : > { %545 = vst.msk [vmem:[#allocation4] sm:$0xff] %vm406_vm2, %v544_v42  ;;  %v710_v45 = vpop.f32.mrb[3].mxu1 }
 0x304   : > { %v551_v49 = vld [vmem:[#allocation4] sm:$0xff] }
 0x348   : > { %v557_v50 = vpop.permute.xlu0 %556 }
 0x349   : > { %v559_v51 = vmul.f32 %v557_v50, %v551_v49 }
 0x34b   : > { %v560_v52 = vpack.c.bf16 %v559_v51, %v559_v51 }
 0x34d   : > { %562 = vst.msk [vmem:[%s382_s16] sm:$0xf] %vm561_vm7, %v560_v52 }
 0x34e PF: > { %s20_s22 = sadd.s32 1, %s787_s22   ;;  %s907_s20 = smov %s783_s21 }
 0x34f   : > { %p17_p0 = scmp.ge.s32.totalorder %s20_s22, 10   ;;  %s908_s21 = smov %s910_s0 }
 0x351   :  { %19 = sbr.rel (!%p17_p0) target bundleno = 17 (0x11), region = 76 }

</bundles_post_ra>
